<compile_context>
chip_gen: v6e
topology: v6e:2x2x1
jax: 0.10.0
libtpu: 0.0.40
codegen_flags: <defaults>
</compile_context>

<pallas_src>
import jax
import jax.numpy as jnp
from jax import lax
from jax.experimental import pallas as pl
from jax.experimental.pallas import tpu as pltpu

# Synthetic stand-ins for GetAtomFeaturesDim() / GetBondFeaturesDim()
ATOM_FEATURE_DIMS = [7, 5, 4]   # node one-hot feature segment sizes
BOND_FEATURE_DIMS = [5, 3]      # edge one-hot feature segment sizes
BN_EPS = 1e-5
LANE = 128
SUBLANE = 8


def _round_up(x, m):
    return (x + m - 1) // m * m


def _pad_axis(x, target, axis, value=0):
    pad = target - x.shape[axis]
    if pad <= 0:
        return x
    widths = [(0, 0)] * x.ndim
    widths[axis] = (0, pad)
    return jnp.pad(x, widths, constant_values=value)


# --------------------------------------------------------------------------
# Fused kernel: grid over layers, h + one-hot operators resident in VMEM.
#   layer l:  eemb = bond_onehot @ bond_table[l]
#             aggr = sdst @ relu(gsrc @ h + eemb)
#             h    = (1+eps[l])*h + aggr
#             h    = Linear(D,2D)+BNfold -> ReLU -> Linear(2D,D)+BNfold
#             h    = ReLU(h) on all but last layer
#   last layer additionally runs the readout MLP and writes (Np,128) output.
# --------------------------------------------------------------------------
def _gnn_fused_kernel(src_ref, dst_ref, h0_ref, bonh_ref, btab_ref,
                      eps_ref, w1_ref, bias_ref, w2_ref,
                      wr1_ref, wr2_ref, wr3_ref, rbias_ref, wr4_ref, rb4_ref,
                      a_ref,
                      out_ref, h_ref, gsrc_ref, sdst_ref):
    l = pl.program_id(0)
    last = pl.num_programs(0) - 1
    dp = w2_ref.shape[1]

    @pl.when(l == 0)
    def _init():
        # Node state + one-hot gather/scatter operators, built once (layer 0)
        # and reused for all layers (src/dst never change).
        h_ref[...] = h0_ref[...]
        e_p, n_p = gsrc_ref.shape
        edge_node_ids = lax.broadcasted_iota(jnp.int32, (e_p, n_p), 1)
        gsrc_ref[...] = jnp.where(src_ref[...] == edge_node_ids,
                                  1.0, 0.0).astype(jnp.bfloat16)
        node_edge_ids = lax.broadcasted_iota(jnp.int32, (n_p, e_p), 0)
        sdst_ref[...] = jnp.where(dst_ref[...] == node_edge_ids,
                                  1.0, 0.0).astype(jnp.bfloat16)

    x = h_ref[...]                                   # (Np, Dp) f32 node state
    xb = x.astype(jnp.bfloat16)

    # Per-layer edge embeddings from the tiny streamed bond table (exact
    # re-expression of the sum-of-embedding-lookups BondEncoder).
    eemb = jnp.dot(bonh_ref[...], btab_ref[...],
                   preferred_element_type=jnp.float32)               # (Ep, Dp)

    x_src = jnp.dot(gsrc_ref[...], xb, preferred_element_type=jnp.float32)
    msg = jnp.maximum(x_src + eemb, 0.0).astype(jnp.bfloat16)        # relu(x_j+e)
    aggr = jnp.dot(sdst_ref[...], msg, preferred_element_type=jnp.float32)

    h = (1.0 + eps_ref[l]) * x + aggr
    # GINConv.mlp with BN folded into the linears (inference mode).
    h = jnp.dot(h.astype(jnp.bfloat16), w1_ref[...],
                preferred_element_type=jnp.float32) + bias_ref[0:1, :]
    h = jnp.maximum(h, 0.0)
    h = jnp.dot(h.astype(jnp.bfloat16), w2_ref[...],
                preferred_element_type=jnp.float32) + bias_ref[1:2, :dp]

    @pl.when(l != last)
    def _store_relu():
        h_ref[...] = jnp.maximum(h, 0.0)              # outer BN folded; dropout=id

    @pl.when(l == last)
    def _readout():
        def prelu(v, a):
            return jnp.maximum(v, 0.0) + a * jnp.minimum(v, 0.0)

        r = prelu(jnp.dot(h.astype(jnp.bfloat16), wr1_ref[...],
                          preferred_element_type=jnp.float32)
                  + rbias_ref[0:1, :], a_ref[0])
        r = prelu(jnp.dot(r.astype(jnp.bfloat16), wr2_ref[...],
                          preferred_element_type=jnp.float32)
                  + rbias_ref[1:2, :], a_ref[1])
        r = prelu(jnp.dot(r.astype(jnp.bfloat16), wr3_ref[...],
                          preferred_element_type=jnp.float32)
                  + rbias_ref[2:3, :], a_ref[2])
        out_ref[...] = (jnp.dot(r.astype(jnp.bfloat16), wr4_ref[...],
                                preferred_element_type=jnp.float32)
                        + rb4_ref[...])


def _const_spec(shape):
    nd = len(shape)
    return pl.BlockSpec(tuple(shape), lambda l, nd=nd: (0,) * nd)


def _layer_spec(shape):
    nd = len(shape)
    return pl.BlockSpec((None,) + tuple(shape), lambda l, nd=nd: (l,) + (0,) * nd)


def _smem_spec():
    return pl.BlockSpec(memory_space=pltpu.MemorySpace.SMEM)


# --------------------------------------------------------------------------
# Plain-JAX glue: encoders, BN folding, padding, stacking, params.
# --------------------------------------------------------------------------
def multi_embedding_indices(feat, dims):
    idxs, start = [], 0
    for d in dims:
        idxs.append(jnp.argmax(feat[:, start:start + d], axis=1))
        start += d
    return idxs


def multi_embedding_from_indices(idxs, tables):
    out = 0.0
    for idx, table in zip(idxs, tables):
        out = out + jnp.take(table, idx, axis=0)
    return out


def xavier_uniform(key, num_emb, emb_dim):
    bound = (6.0 / (num_emb + emb_dim)) ** 0.5
    return jax.random.uniform(key, (num_emb, emb_dim), jnp.float32, -bound, bound)


def linear_init(key, fan_in, fan_out):
    kw, kb = jax.random.split(key)
    bound = 1.0 / (fan_in ** 0.5)
    w = jax.random.uniform(kw, (fan_in, fan_out), jnp.float32, -bound, bound)
    b = jax.random.uniform(kb, (1, fan_out), jnp.float32, -bound, bound)
    return w, b


def bn_scale_shift(dim):
    gamma = jnp.ones((1, dim), jnp.float32)
    beta = jnp.zeros((1, dim), jnp.float32)
    running_mean = jnp.zeros((1, dim), jnp.float32)
    running_var = jnp.ones((1, dim), jnp.float32)
    scale = gamma / jnp.sqrt(running_var + BN_EPS)
    shift = beta - running_mean * scale
    return scale, shift


def build_params(key, num_layers, emb_dim):
    keys = iter(jax.random.split(key, 8 + num_layers * 8))
    atom_tables = [xavier_uniform(next(keys), d, emb_dim) for d in ATOM_FEATURE_DIMS]

    gin_params, bond_tables = [], []
    for _ in range(num_layers):
        eps = jnp.zeros((1,), jnp.float32)                 # GINConv.eps init = 0
        w1, b1 = linear_init(next(keys), emb_dim, 2 * emb_dim)
        s1, t1 = bn_scale_shift(2 * emb_dim)               # BN inside mlp
        w2, b2 = linear_init(next(keys), 2 * emb_dim, emb_dim)
        s2, t2 = bn_scale_shift(emb_dim)                   # outer BatchNorm1d
        gin_params.append((eps, w1, b1, s1, t1, w2, b2, s2, t2))
        bond_tables.append(
            [xavier_uniform(next(keys), d, emb_dim) for d in BOND_FEATURE_DIMS])

    rw1, rb1 = linear_init(next(keys), emb_dim, emb_dim)
    rw2, rb2 = linear_init(next(keys), emb_dim, emb_dim)
    rw3, rb3 = linear_init(next(keys), emb_dim, emb_dim)
    rw4, rb4 = linear_init(next(keys), emb_dim, 1)
    prelu_a = jnp.full((3,), 0.25, jnp.float32)            # PReLU default slope
    readout_params = (prelu_a, rw1, rb1, rw2, rb2, rw3, rb3, rw4, rb4)

    return atom_tables, bond_tables, gin_params, readout_params


def gnn_forward(x, edge_index, edge_attr, mask,
                atom_tables, bond_tables, gin_params, readout_params,
                num_layers):
    N = x.shape[0]
    E = edge_index.shape[1]
    D = atom_tables[0].shape[1]
    H = 2 * D
    L = num_layers
    B = sum(BOND_FEATURE_DIMS)
    # Lane-dense padding: N and E both appear as lane (minor) dims of the
    # one-hot operators, so pad them to 128 multiples; features to 128.
    Np = _round_up(N, LANE)
    Ep = _round_up(E, LANE)
    Dp = _round_up(D, LANE)
    Hp = _round_up(H, LANE)
    Bp = _round_up(B, SUBLANE)

    # Atom encoder (argmax + embedding sums, computed once on the host/XLA side).
    atom_idx = multi_embedding_indices(x, ATOM_FEATURE_DIMS)
    h0 = multi_embedding_from_indices(atom_idx, atom_tables)             # (N, D)
    h0p = _pad_axis(_pad_axis(h0, Np, 0), Dp, 1)

    # Bond one-hot (Ep, Bp); per-layer edge embeddings are formed in-kernel as
    # bonh @ stacked_bond_table[l]  (exactly the sum of embedding lookups).
    bond_idx = multi_embedding_indices(edge_attr, BOND_FEATURE_DIMS)
    offsets, start = [], 0
    for d in BOND_FEATURE_DIMS:
        offsets.append(start)
        start += d
    bonh = 0.0
    for idx, off in zip(bond_idx, offsets):
        bonh = bonh + jax.nn.one_hot(idx + off, Bp, dtype=jnp.float32)
    bonh = _pad_axis(bonh, Ep, 0).astype(jnp.bfloat16)                   # (Ep, Bp)

    btabs = jnp.stack([
        _pad_axis(_pad_axis(jnp.concatenate(bond_tables[l], axis=0), Bp, 0), Dp, 1)
        for l in range(L)], axis=0).astype(jnp.bfloat16)                 # (L, Bp, Dp)

    # Edge indices; padded entries use sentinel Np (matches no node -> zero row).
    src = _pad_axis(edge_index[0].astype(jnp.int32)[:, None], Ep, 0, value=Np)
    dst = _pad_axis(edge_index[1].astype(jnp.int32)[None, :], Ep, 1, value=Np)

    # Per-layer GIN params with the inference BatchNorms folded into the linears.
    w1s, w2s, biases, eps_list = [], [], [], []
    for (eps, w1, b1, s1, t1, w2, b2, s2, t2) in gin_params:
        w1f = w1 * s1
        b1f = b1 * s1 + t1
        w2f = w2 * s2
        b2f = b2 * s2 + t2
        w1s.append(_pad_axis(_pad_axis(w1f, Dp, 0), Hp, 1))
        w2s.append(_pad_axis(_pad_axis(w2f, Hp, 0), Dp, 1))
        biases.append(jnp.concatenate(
            [_pad_axis(b1f, Hp, 1), _pad_axis(b2f, Hp, 1)], axis=0))     # (2, Hp)
        eps_list.append(eps.reshape(()))
    w1s = jnp.stack(w1s, axis=0).astype(jnp.bfloat16)                    # (L, Dp, Hp)
    w2s = jnp.stack(w2s, axis=0).astype(jnp.bfloat16)                    # (L, Hp, Dp)
    biases = jnp.stack(biases, axis=0)                                   # (L, 2, Hp)
    eps_all = jnp.stack(eps_list, axis=0)                                # (L,) SMEM

    # Readout parameters (bf16 weights; final Linear(D,1) kept lane-dense).
    a, rw1, rb1, rw2, rb2, rw3, rb3, rw4, rb4 = readout_params
    wr1p = _pad_axis(_pad_axis(rw1, Dp, 0), Dp, 1).astype(jnp.bfloat16)
    wr2p = _pad_axis(_pad_axis(rw2, Dp, 0), Dp, 1).astype(jnp.bfloat16)
    wr3p = _pad_axis(_pad_axis(rw3, Dp, 0), Dp, 1).astype(jnp.bfloat16)
    rbias = jnp.concatenate([_pad_axis(rb1, Dp, 1),
                             _pad_axis(rb2, Dp, 1),
                             _pad_axis(rb3, Dp, 1)], axis=0)             # (3, Dp)
    wr4p = _pad_axis(_pad_axis(rw4, Dp, 0), LANE, 1).astype(jnp.bfloat16)
    rb4p = _pad_axis(rb4, LANE, 1)
    a_vec = a.reshape(3)                                                 # SMEM

    args = (src, dst, h0p, bonh, btabs, eps_all, w1s, biases, w2s,
            wr1p, wr2p, wr3p, rbias, wr4p, rb4p, a_vec)

    in_specs = [
        _const_spec((Ep, 1)),                     # src indices (resident)
        _const_spec((1, Ep)),                     # dst indices (resident)
        _const_spec((Np, Dp)),                    # initial node embeddings
        _const_spec((Ep, Bp)),                    # bond one-hot (resident)
        _layer_spec((Bp, Dp)),                    # per-layer bond tables
        _smem_spec(),                             # eps[l] (SMEM scalars)
        _layer_spec((Dp, Hp)),                    # w1 (BN folded)
        _layer_spec((2, Hp)),                     # b1 / b2 (consolidated)
        _layer_spec((Hp, Dp)),                    # w2 (BN folded)
        _const_spec((Dp, Dp)), _const_spec((Dp, Dp)), _const_spec((Dp, Dp)),
        _const_spec((3, Dp)),                     # readout biases 1..3
        _const_spec((Dp, LANE)), _const_spec((1, LANE)),
        _smem_spec(),                             # PReLU slopes (SMEM)
    ]

    flops_layer = (2 * Ep * Bp * Dp + 4 * Ep * Np * Dp + 4 * Np * Dp * Hp)
    flops = int(L * flops_layer + 6 * Np * Dp * Dp + 2 * Np * Dp * LANE)
    bytes_accessed = int(sum(int(v.size) * v.dtype.itemsize for v in args)
                         + Np * LANE * 4)

    out = pl.pallas_call(
        _gnn_fused_kernel,
        out_shape=jax.ShapeDtypeStruct((Np, LANE), jnp.float32),
        grid=(L,),
        in_specs=in_specs,
        out_specs=pl.BlockSpec((Np, LANE), lambda l: (0, 0)),
        scratch_shapes=[
            pltpu.VMEM((Np, Dp), jnp.float32),    # node state h (layer-resident)
            pltpu.VMEM((Ep, Np), jnp.bfloat16),   # gather one-hot (built once)
            pltpu.VMEM((Np, Ep), jnp.bfloat16),   # scatter one-hot (built once)
        ],
        compiler_params=pltpu.CompilerParams(
            dimension_semantics=("arbitrary",),
            vmem_limit_bytes=64 * 1024 * 1024),
        cost_estimate=pl.CostEstimate(flops=flops, transcendentals=0,
                                      bytes_accessed=bytes_accessed),
    )(*args)

    node_pred = out[:N, 0]          # drop row/lane padding (lane-dense store)
    # TODO(synk): boolean-mask indexing gives a dynamic shape; keep this
    #             outside jit (or switch to a static-count gather under jit).
    return node_pred[mask]


if __name__ == "__main__":
    num_layers = 6
    emb_dim = 32
    N, E = 16, 32

    key = jax.random.PRNGKey(0)
    k_params, k_x, k_e, k_src, k_dst, k_mask = jax.random.split(key, 6)

    atom_tables, bond_tables, gin_params, readout_params = build_params(
        k_params, num_layers, emb_dim)

    x = jax.random.uniform(k_x, (N, sum(ATOM_FEATURE_DIMS)), jnp.float32)
    edge_attr = jax.random.uniform(k_e, (E, sum(BOND_FEATURE_DIMS)), jnp.float32)
    edge_index = jnp.stack([
        jax.random.randint(k_src, (E,), 0, N),
        jax.random.randint(k_dst, (E,), 0, N)], axis=0).astype(jnp.int32)
    mask = jax.random.bernoulli(k_mask, 0.7, (N,))

    out = gnn_forward(x, edge_index, edge_attr, mask,
                      atom_tables, bond_tables, gin_params, readout_params,
                      num_layers)
    jax.block_until_ready(out)
    assert out.ndim == 1 and bool(jnp.all(jnp.isfinite(out)))
    print("KERNEL_OK")
</pallas_src>

<mosaic_0001>
module attributes {stable_mosaic.version = 11 : i64} {
  func.func @_gnn_fused_kernel(%arg0: i32, %arg1: memref<128x1xi32, #tpu.memory_space<vmem>>, %arg2: memref<1x128xi32, #tpu.memory_space<vmem>>, %arg3: memref<128x128xf32, #tpu.memory_space<vmem>>, %arg4: memref<128x8xbf16, #tpu.memory_space<vmem>>, %arg5: memref<1x8x128xbf16, #tpu.memory_space<vmem>>, %arg6: memref<6xf32, #tpu.memory_space<smem>>, %arg7: memref<1x128x128xbf16, #tpu.memory_space<vmem>>, %arg8: memref<1x2x128xf32, #tpu.memory_space<vmem>>, %arg9: memref<1x128x128xbf16, #tpu.memory_space<vmem>>, %arg10: memref<128x128xbf16, #tpu.memory_space<vmem>>, %arg11: memref<128x128xbf16, #tpu.memory_space<vmem>>, %arg12: memref<128x128xbf16, #tpu.memory_space<vmem>>, %arg13: memref<3x128xf32, #tpu.memory_space<vmem>>, %arg14: memref<128x128xbf16, #tpu.memory_space<vmem>>, %arg15: memref<1x128xf32, #tpu.memory_space<vmem>>, %arg16: memref<3xf32, #tpu.memory_space<smem>>, %arg17: memref<128x128xf32, #tpu.memory_space<vmem>>, %arg18: memref<128x128xf32, #tpu.memory_space<vmem>>, %arg19: memref<128x128xbf16, #tpu.memory_space<vmem>>, %arg20: memref<128x128xbf16, #tpu.memory_space<vmem>>) attributes {dimension_semantics = [#tpu.dimension_semantics<arbitrary>], iteration_bounds = array<i64: 6>, scalar_prefetch = 0 : i64, scratch_operands = 3 : i64, tpu.core_type = #tpu.core_type<tc>, window_params = [{pipeline_mode = #tpu.pipeline_mode<synchronous>, transform_indices = @transform_0, window_bounds = array<i64: 128, 1>}, {pipeline_mode = #tpu.pipeline_mode<synchronous>, transform_indices = @transform_1, window_bounds = array<i64: 1, 128>}, {pipeline_mode = #tpu.pipeline_mode<synchronous>, transform_indices = @transform_2, window_bounds = array<i64: 128, 128>}, {pipeline_mode = #tpu.pipeline_mode<synchronous>, transform_indices = @transform_3, window_bounds = array<i64: 128, 8>}, {transform_indices = @transform_4, window_bounds = array<i64: 1, 8, 128>}, {transform_indices = @transform_5, window_bounds = array<i64: 6>}, {transform_indices = @transform_6, window_bounds = array<i64: 1, 128, 128>}, {transform_indices = @transform_7, window_bounds = array<i64: 1, 2, 128>}, {transform_indices = @transform_8, window_bounds = array<i64: 1, 128, 128>}, {pipeline_mode = #tpu.pipeline_mode<synchronous>, transform_indices = @transform_9, window_bounds = array<i64: 128, 128>}, {pipeline_mode = #tpu.pipeline_mode<synchronous>, transform_indices = @transform_10, window_bounds = array<i64: 128, 128>}, {pipeline_mode = #tpu.pipeline_mode<synchronous>, transform_indices = @transform_11, window_bounds = array<i64: 128, 128>}, {pipeline_mode = #tpu.pipeline_mode<synchronous>, transform_indices = @transform_12, window_bounds = array<i64: 3, 128>}, {pipeline_mode = #tpu.pipeline_mode<synchronous>, transform_indices = @transform_13, window_bounds = array<i64: 128, 128>}, {pipeline_mode = #tpu.pipeline_mode<synchronous>, transform_indices = @transform_14, window_bounds = array<i64: 1, 128>}, {transform_indices = @transform_15, window_bounds = array<i64: 3>}, {pipeline_mode = #tpu.pipeline_mode<synchronous>, transform_indices = @transform_16, window_bounds = array<i64: 128, 128>}]} {
    %c0_i32 = arith.constant 0 : i32
    %0 = arith.cmpi eq, %arg0, %c0_i32 : i32
    %1 = arith.extui %0 : i1 to i32
    %c0_i32_0 = arith.constant 0 : i32
    %2 = arith.cmpi ne, %1, %c0_i32_0 : i32
    scf.if %2 {
      %c0_32 = arith.constant 0 : index
      %c0_33 = arith.constant 0 : index
      %47 = vector.load %arg3[%c0_32, %c0_33] : memref<128x128xf32, #tpu.memory_space<vmem>>, vector<128x128xf32>
      %c0_34 = arith.constant 0 : index
      %c0_35 = arith.constant 0 : index
      %48 = vector.load %arg18[%c0_34, %c0_35] : memref<128x128xf32, #tpu.memory_space<vmem>>, vector<128x128xf32>
      tpu.vector_store %arg18[%c0_34, %c0_35], %47 {strides = array<i32>} : memref<128x128xf32, #tpu.memory_space<vmem>>, vector<128x128xf32>,
      %49 = tpu.iota {dimensions = array<i32: 1>} : vector<128x128xi32>
      %c0_36 = arith.constant 0 : index
      %c0_37 = arith.constant 0 : index
      %50 = vector.load %arg1[%c0_36, %c0_37] : memref<128x1xi32, #tpu.memory_space<vmem>>, vector<128x1xi32>
      %51 = vector.broadcast %50 : vector<128x1xi32> to vector<128x128xi32>
      %52 = arith.cmpi eq, %51, %49 : vector<128x128xi32>
      %cst_38 = arith.constant 1.000000e+00 : f32
      %cst_39 = arith.constant 0.000000e+00 : f32
      %53 = vector.broadcast %cst_38 : f32 to vector<128x128xf32>
      %54 = vector.broadcast %cst_39 : f32 to vector<128x128xf32>
      %55 = arith.select %52, %53, %54 : vector<128x128xi1>, vector<128x128xf32>
      %56 = arith.truncf %55 : vector<128x128xf32> to vector<128x128xbf16>
      %c0_40 = arith.constant 0 : index
      %c0_41 = arith.constant 0 : index
      %57 = vector.load %arg19[%c0_40, %c0_41] : memref<128x128xbf16, #tpu.memory_space<vmem>>, vector<128x128xbf16>
      tpu.vector_store %arg19[%c0_40, %c0_41], %56 {strides = array<i32>} : memref<128x128xbf16, #tpu.memory_space<vmem>>, vector<128x128xbf16>,
      %58 = tpu.iota {dimensions = array<i32: 0>} : vector<128x128xi32>
      %c0_42 = arith.constant 0 : index
      %c0_43 = arith.constant 0 : index
      %59 = vector.load %arg2[%c0_42, %c0_43] : memref<1x128xi32, #tpu.memory_space<vmem>>, vector<1x128xi32>
      %60 = vector.broadcast %59 : vector<1x128xi32> to vector<128x128xi32>
      %61 = arith.cmpi eq, %60, %58 : vector<128x128xi32>
      %cst_44 = arith.constant 1.000000e+00 : f32
      %cst_45 = arith.constant 0.000000e+00 : f32
      %62 = vector.broadcast %cst_44 : f32 to vector<128x128xf32>
      %63 = vector.broadcast %cst_45 : f32 to vector<128x128xf32>
      %64 = arith.select %61, %62, %63 : vector<128x128xi1>, vector<128x128xf32>
      %65 = arith.truncf %64 : vector<128x128xf32> to vector<128x128xbf16>
      %c0_46 = arith.constant 0 : index
      %c0_47 = arith.constant 0 : index
      %66 = vector.load %arg20[%c0_46, %c0_47] : memref<128x128xbf16, #tpu.memory_space<vmem>>, vector<128x128xbf16>
      tpu.vector_store %arg20[%c0_46, %c0_47], %65 {strides = array<i32>} : memref<128x128xbf16, #tpu.memory_space<vmem>>, vector<128x128xbf16>,
    } else {
    }
    %c0 = arith.constant 0 : index
    %c0_1 = arith.constant 0 : index
    %3 = vector.load %arg18[%c0, %c0_1] : memref<128x128xf32, #tpu.memory_space<vmem>>, vector<128x128xf32>
    %4 = arith.truncf %3 : vector<128x128xf32> to vector<128x128xbf16>
    %c0_2 = arith.constant 0 : index
    %c0_3 = arith.constant 0 : index
    %5 = vector.load %arg4[%c0_2, %c0_3] : memref<128x8xbf16, #tpu.memory_space<vmem>>, vector<128x8xbf16>
    %c0_4 = arith.constant 0 : index
    %c0_5 = arith.constant 0 : index
    %c0_6 = arith.constant 0 : index
    %6 = vector.load %arg5[%c0_4, %c0_5, %c0_6] : memref<1x8x128xbf16, #tpu.memory_space<vmem>>, vector<1x8x128xbf16>
    %7 = vector.shape_cast %6 : vector<1x8x128xbf16> to vector<8x128xbf16>
    %cst = arith.constant dense<0.000000e+00> : vector<128x128xf32>
    %8 = tpu.matmul %5, %7, %cst {dimension_numbers = #tpu.dot_dimension_numbers<[1], [0], [0], [1], [0, 0, 1, 1], [], []>} : vector<128x8xbf16>, vector<8x128xbf16>, vector<128x128xf32> -> vector<128x128xf32>
    %c0_7 = arith.constant 0 : index
    %c0_8 = arith.constant 0 : index
    %9 = vector.load %arg19[%c0_7, %c0_8] : memref<128x128xbf16, #tpu.memory_space<vmem>>, vector<128x128xbf16>
    %cst_9 = arith.constant dense<0.000000e+00> : vector<128x128xf32>
    %10 = tpu.matmul %9, %4, %cst_9 {dimension_numbers = #tpu.dot_dimension_numbers<[1], [0], [0], [1], [0, 0, 1, 1], [], []>} : vector<128x128xbf16>, vector<128x128xbf16>, vector<128x128xf32> -> vector<128x128xf32>
    %11 = arith.addf %10, %8 : vector<128x128xf32>
    %cst_10 = arith.constant 0.000000e+00 : f32
    %12 = vector.broadcast %cst_10 : f32 to vector<128x128xf32>
    %13 = arith.maximumf %11, %12 : vector<128x128xf32>
    %14 = arith.truncf %13 : vector<128x128xf32> to vector<128x128xbf16>
    %c0_11 = arith.constant 0 : index
    %c0_12 = arith.constant 0 : index
    %15 = vector.load %arg20[%c0_11, %c0_12] : memref<128x128xbf16, #tpu.memory_space<vmem>>, vector<128x128xbf16>
    %cst_13 = arith.constant dense<0.000000e+00> : vector<128x128xf32>
    %16 = tpu.matmul %15, %14, %cst_13 {dimension_numbers = #tpu.dot_dimension_numbers<[1], [0], [0], [1], [0, 0, 1, 1], [], []>} : vector<128x128xbf16>, vector<128x128xbf16>, vector<128x128xf32> -> vector<128x128xf32>
    %17 = arith.index_cast %arg0 : i32 to index
    %18 = memref.load %arg6[%17] : memref<6xf32, #tpu.memory_space<smem>>
    %cst_14 = arith.constant 1.000000e+00 : f32
    %19 = arith.addf %cst_14, %18 : f32
    %20 = vector.broadcast %19 : f32 to vector<128x128xf32>
    %21 = arith.mulf %20, %3 : vector<128x128xf32>
    %22 = arith.addf %21, %16 : vector<128x128xf32>
    %23 = arith.truncf %22 : vector<128x128xf32> to vector<128x128xbf16>
    %c0_15 = arith.constant 0 : index
    %c0_16 = arith.constant 0 : index
    %c0_17 = arith.constant 0 : index
    %24 = vector.load %arg7[%c0_15, %c0_16, %c0_17] : memref<1x128x128xbf16, #tpu.memory_space<vmem>>, vector<1x128x128xbf16>
    %25 = vector.shape_cast %24 : vector<1x128x128xbf16> to vector<128x128xbf16>
    %cst_18 = arith.constant dense<0.000000e+00> : vector<128x128xf32>
    %26 = tpu.matmul %23, %25, %cst_18 {dimension_numbers = #tpu.dot_dimension_numbers<[1], [0], [0], [1], [0, 0, 1, 1], [], []>} : vector<128x128xbf16>, vector<128x128xbf16>, vector<128x128xf32> -> vector<128x128xf32>
    %c0_19 = arith.constant 0 : index
    %c0_20 = arith.constant 0 : index
    %c0_21 = arith.constant 0 : index
    %27 = vector.load %arg8[%c0_19, %c0_20, %c0_21] : memref<1x2x128xf32, #tpu.memory_space<vmem>>, vector<1x1x128xf32>
    %28 = vector.shape_cast %27 : vector<1x1x128xf32> to vector<1x128xf32>
    %29 = vector.broadcast %28 : vector<1x128xf32> to vector<128x128xf32>
    %30 = arith.addf %26, %29 : vector<128x128xf32>
    %cst_22 = arith.constant 0.000000e+00 : f32
    %31 = vector.broadcast %cst_22 : f32 to vector<128x128xf32>
    %32 = arith.maximumf %30, %31 : vector<128x128xf32>
    %33 = arith.truncf %32 : vector<128x128xf32> to vector<128x128xbf16>
    %c0_23 = arith.constant 0 : index
    %c0_24 = arith.constant 0 : index
    %c0_25 = arith.constant 0 : index
    %34 = vector.load %arg9[%c0_23, %c0_24, %c0_25] : memref<1x128x128xbf16, #tpu.memory_space<vmem>>, vector<1x128x128xbf16>
    %35 = vector.shape_cast %34 : vector<1x128x128xbf16> to vector<128x128xbf16>
    %cst_26 = arith.constant dense<0.000000e+00> : vector<128x128xf32>
    %36 = tpu.matmul %33, %35, %cst_26 {dimension_numbers = #tpu.dot_dimension_numbers<[1], [0], [0], [1], [0, 0, 1, 1], [], []>} : vector<128x128xbf16>, vector<128x128xbf16>, vector<128x128xf32> -> vector<128x128xf32>
    %c0_27 = arith.constant 0 : index
    %c1 = arith.constant 1 : index
    %c0_28 = arith.constant 0 : index
    %37 = vector.load %arg8[%c0_27, %c1, %c0_28] : memref<1x2x128xf32, #tpu.memory_space<vmem>>, vector<1x1x128xf32>
    %38 = vector.shape_cast %37 : vector<1x1x128xf32> to vector<1x128xf32>
    %39 = vector.broadcast %38 : vector<1x128xf32> to vector<128x128xf32>
    %40 = arith.addf %36, %39 : vector<128x128xf32>
    %c5_i32 = arith.constant 5 : i32
    %41 = arith.cmpi ne, %arg0, %c5_i32 : i32
    %42 = arith.extui %41 : i1 to i32
    %c0_i32_29 = arith.constant 0 : i32
    %43 = arith.cmpi ne, %42, %c0_i32_29 : i32
    scf.if %43 {
      %cst_32 = arith.constant 0.000000e+00 : f32
      %47 = vector.broadcast %cst_32 : f32 to vector<128x128xf32>
      %48 = arith.maximumf %40, %47 : vector<128x128xf32>
      %c0_33 = arith.constant 0 : index
      %c0_34 = arith.constant 0 : index
      %49 = vector.load %arg18[%c0_33, %c0_34] : memref<128x128xf32, #tpu.memory_space<vmem>>, vector<128x128xf32>
      tpu.vector_store %arg18[%c0_33, %c0_34], %48 {strides = array<i32>} : memref<128x128xf32, #tpu.memory_space<vmem>>, vector<128x128xf32>,
    } else {
    }
    %c5_i32_30 = arith.constant 5 : i32
    %44 = arith.cmpi eq, %arg0, %c5_i32_30 : i32
    %45 = arith.extui %44 : i1 to i32
    %c0_i32_31 = arith.constant 0 : i32
    %46 = arith.cmpi ne, %45, %c0_i32_31 : i32
    scf.if %46 {
      %47 = arith.truncf %40 : vector<128x128xf32> to vector<128x128xbf16>
      %c0_32 = arith.constant 0 : index
      %c0_33 = arith.constant 0 : index
      %48 = vector.load %arg10[%c0_32, %c0_33] : memref<128x128xbf16, #tpu.memory_space<vmem>>, vector<128x128xbf16>
      %cst_34 = arith.constant dense<0.000000e+00> : vector<128x128xf32>
      %49 = tpu.matmul %47, %48, %cst_34 {dimension_numbers = #tpu.dot_dimension_numbers<[1], [0], [0], [1], [0, 0, 1, 1], [], []>} : vector<128x128xbf16>, vector<128x128xbf16>, vector<128x128xf32> -> vector<128x128xf32>
      %c0_35 = arith.constant 0 : index
      %c0_36 = arith.constant 0 : index
      %50 = vector.load %arg13[%c0_35, %c0_36] : memref<3x128xf32, #tpu.memory_space<vmem>>, vector<1x128xf32>
      %51 = vector.broadcast %50 : vector<1x128xf32> to vector<128x128xf32>
      %52 = arith.addf %49, %51 : vector<128x128xf32>
      %c0_37 = arith.constant 0 : index
      %53 = memref.load %arg16[%c0_37] : memref<3xf32, #tpu.memory_space<smem>>
      %cst_38 = arith.constant 0.000000e+00 : f32
      %54 = vector.broadcast %cst_38 : f32 to vector<128x128xf32>
      %55 = arith.maximumf %52, %54 : vector<128x128xf32>
      %cst_39 = arith.constant 0.000000e+00 : f32
      %56 = vector.broadcast %cst_39 : f32 to vector<128x128xf32>
      %57 = arith.minimumf %52, %56 : vector<128x128xf32>
      %58 = vector.broadcast %53 : f32 to vector<128x128xf32>
      %59 = arith.mulf %58, %57 : vector<128x128xf32>
      %60 = arith.addf %55, %59 : vector<128x128xf32>
      %61 = arith.truncf %60 : vector<128x128xf32> to vector<128x128xbf16>
      %c0_40 = arith.constant 0 : index
      %c0_41 = arith.constant 0 : index
      %62 = vector.load %arg11[%c0_40, %c0_41] : memref<128x128xbf16, #tpu.memory_space<vmem>>, vector<128x128xbf16>
      %cst_42 = arith.constant dense<0.000000e+00> : vector<128x128xf32>
      %63 = tpu.matmul %61, %62, %cst_42 {dimension_numbers = #tpu.dot_dimension_numbers<[1], [0], [0], [1], [0, 0, 1, 1], [], []>} : vector<128x128xbf16>, vector<128x128xbf16>, vector<128x128xf32> -> vector<128x128xf32>
      %c1_43 = arith.constant 1 : index
      %c0_44 = arith.constant 0 : index
      %64 = vector.load %arg13[%c1_43, %c0_44] : memref<3x128xf32, #tpu.memory_space<vmem>>, vector<1x128xf32>
      %65 = vector.broadcast %64 : vector<1x128xf32> to vector<128x128xf32>
      %66 = arith.addf %63, %65 : vector<128x128xf32>
      %c1_45 = arith.constant 1 : index
      %67 = memref.load %arg16[%c1_45] : memref<3xf32, #tpu.memory_space<smem>>
      %cst_46 = arith.constant 0.000000e+00 : f32
      %68 = vector.broadcast %cst_46 : f32 to vector<128x128xf32>
      %69 = arith.maximumf %66, %68 : vector<128x128xf32>
      %cst_47 = arith.constant 0.000000e+00 : f32
      %70 = vector.broadcast %cst_47 : f32 to vector<128x128xf32>
      %71 = arith.minimumf %66, %70 : vector<128x128xf32>
      %72 = vector.broadcast %67 : f32 to vector<128x128xf32>
      %73 = arith.mulf %72, %71 : vector<128x128xf32>
      %74 = arith.addf %69, %73 : vector<128x128xf32>
      %75 = arith.truncf %74 : vector<128x128xf32> to vector<128x128xbf16>
      %c0_48 = arith.constant 0 : index
      %c0_49 = arith.constant 0 : index
      %76 = vector.load %arg12[%c0_48, %c0_49] : memref<128x128xbf16, #tpu.memory_space<vmem>>, vector<128x128xbf16>
      %cst_50 = arith.constant dense<0.000000e+00> : vector<128x128xf32>
      %77 = tpu.matmul %75, %76, %cst_50 {dimension_numbers = #tpu.dot_dimension_numbers<[1], [0], [0], [1], [0, 0, 1, 1], [], []>} : vector<128x128xbf16>, vector<128x128xbf16>, vector<128x128xf32> -> vector<128x128xf32>
      %c2 = arith.constant 2 : index
      %c0_51 = arith.constant 0 : index
      %78 = vector.load %arg13[%c2, %c0_51] : memref<3x128xf32, #tpu.memory_space<vmem>>, vector<1x128xf32>
      %79 = vector.broadcast %78 : vector<1x128xf32> to vector<128x128xf32>
      %80 = arith.addf %77, %79 : vector<128x128xf32>
      %c2_52 = arith.constant 2 : index
      %81 = memref.load %arg16[%c2_52] : memref<3xf32, #tpu.memory_space<smem>>
      %cst_53 = arith.constant 0.000000e+00 : f32
      %82 = vector.broadcast %cst_53 : f32 to vector<128x128xf32>
      %83 = arith.maximumf %80, %82 : vector<128x128xf32>
      %cst_54 = arith.constant 0.000000e+00 : f32
      %84 = vector.broadcast %cst_54 : f32 to vector<128x128xf32>
      %85 = arith.minimumf %80, %84 : vector<128x128xf32>
      %86 = vector.broadcast %81 : f32 to vector<128x128xf32>
      %87 = arith.mulf %86, %85 : vector<128x128xf32>
      %88 = arith.addf %83, %87 : vector<128x128xf32>
      %89 = arith.truncf %88 : vector<128x128xf32> to vector<128x128xbf16>
      %c0_55 = arith.constant 0 : index
      %c0_56 = arith.constant 0 : index
      %90 = vector.load %arg14[%c0_55, %c0_56] : memref<128x128xbf16, #tpu.memory_space<vmem>>, vector<128x128xbf16>
      %cst_57 = arith.constant dense<0.000000e+00> : vector<128x128xf32>
      %91 = tpu.matmul %89, %90, %cst_57 {dimension_numbers = #tpu.dot_dimension_numbers<[1], [0], [0], [1], [0, 0, 1, 1], [], []>} : vector<128x128xbf16>, vector<128x128xbf16>, vector<128x128xf32> -> vector<128x128xf32>
      %c0_58 = arith.constant 0 : index
      %c0_59 = arith.constant 0 : index
      %92 = vector.load %arg15[%c0_58, %c0_59] : memref<1x128xf32, #tpu.memory_space<vmem>>, vector<1x128xf32>
      %93 = vector.broadcast %92 : vector<1x128xf32> to vector<128x128xf32>
      %94 = arith.addf %91, %93 : vector<128x128xf32>
      %c0_60 = arith.constant 0 : index
      %c0_61 = arith.constant 0 : index
      %95 = vector.load %arg17[%c0_60, %c0_61] : memref<128x128xf32, #tpu.memory_space<vmem>>, vector<128x128xf32>
      tpu.vector_store %arg17[%c0_60, %c0_61], %94 {strides = array<i32>} : memref<128x128xf32, #tpu.memory_space<vmem>>, vector<128x128xf32>,
    } else {
    }
    return
  }
  func.func @transform_0(%arg0: i32) -> (i32, i32) {
    %c0_i32 = arith.constant 0 : i32
    %c0_i32_0 = arith.constant 0 : i32
    %c0_i32_1 = arith.constant 0 : i32
    return %c0_i32, %c0_i32_0 : i32, i32
  }
  func.func @transform_1(%arg0: i32) -> (i32, i32) {
    %c0_i32 = arith.constant 0 : i32
    %c0_i32_0 = arith.constant 0 : i32
    %c0_i32_1 = arith.constant 0 : i32
    return %c0_i32, %c0_i32_0 : i32, i32
  }
  func.func @transform_2(%arg0: i32) -> (i32, i32) {
    %c0_i32 = arith.constant 0 : i32
    %c0_i32_0 = arith.constant 0 : i32
    %c0_i32_1 = arith.constant 0 : i32
    return %c0_i32, %c0_i32_0 : i32, i32
  }
  func.func @transform_3(%arg0: i32) -> (i32, i32) {
    %c0_i32 = arith.constant 0 : i32
    %c0_i32_0 = arith.constant 0 : i32
    %c0_i32_1 = arith.constant 0 : i32
    return %c0_i32, %c0_i32_0 : i32, i32
  }
  func.func @transform_4(%arg0: i32) -> (i32, i32, i32) {
    %c0_i32 = arith.constant 0 : i32
    %c0_i32_0 = arith.constant 0 : i32
    %c0_i32_1 = arith.constant 0 : i32
    return %arg0, %c0_i32, %c0_i32_0 : i32, i32, i32
  }
  func.func @transform_5(%arg0: i32) -> i32 {
    %c0_i32 = arith.constant 0 : i32
    %c0_i32_0 = arith.constant 0 : i32
    return %c0_i32 : i32
  }
  func.func @transform_6(%arg0: i32) -> (i32, i32, i32) {
    %c0_i32 = arith.constant 0 : i32
    %c0_i32_0 = arith.constant 0 : i32
    %c0_i32_1 = arith.constant 0 : i32
    return %arg0, %c0_i32, %c0_i32_0 : i32, i32, i32
  }
  func.func @transform_7(%arg0: i32) -> (i32, i32, i32) {
    %c0_i32 = arith.constant 0 : i32
    %c0_i32_0 = arith.constant 0 : i32
    %c0_i32_1 = arith.constant 0 : i32
    return %arg0, %c0_i32, %c0_i32_0 : i32, i32, i32
  }
  func.func @transform_8(%arg0: i32) -> (i32, i32, i32) {
    %c0_i32 = arith.constant 0 : i32
    %c0_i32_0 = arith.constant 0 : i32
    %c0_i32_1 = arith.constant 0 : i32
    return %arg0, %c0_i32, %c0_i32_0 : i32, i32, i32
  }
  func.func @transform_9(%arg0: i32) -> (i32, i32) {
    %c0_i32 = arith.constant 0 : i32
    %c0_i32_0 = arith.constant 0 : i32
    %c0_i32_1 = arith.constant 0 : i32
    return %c0_i32, %c0_i32_0 : i32, i32
  }
  func.func @transform_10(%arg0: i32) -> (i32, i32) {
    %c0_i32 = arith.constant 0 : i32
    %c0_i32_0 = arith.constant 0 : i32
    %c0_i32_1 = arith.constant 0 : i32
    return %c0_i32, %c0_i32_0 : i32, i32
  }
  func.func @transform_11(%arg0: i32) -> (i32, i32) {
    %c0_i32 = arith.constant 0 : i32
    %c0_i32_0 = arith.constant 0 : i32
    %c0_i32_1 = arith.constant 0 : i32
    return %c0_i32, %c0_i32_0 : i32, i32
  }
  func.func @transform_12(%arg0: i32) -> (i32, i32) {
    %c0_i32 = arith.constant 0 : i32
    %c0_i32_0 = arith.constant 0 : i32
    %c0_i32_1 = arith.constant 0 : i32
    return %c0_i32, %c0_i32_0 : i32, i32
  }
  func.func @transform_13(%arg0: i32) -> (i32, i32) {
    %c0_i32 = arith.constant 0 : i32
    %c0_i32_0 = arith.constant 0 : i32
    %c0_i32_1 = arith.constant 0 : i32
    return %c0_i32, %c0_i32_0 : i32, i32
  }
  func.func @transform_14(%arg0: i32) -> (i32, i32) {
    %c0_i32 = arith.constant 0 : i32
    %c0_i32_0 = arith.constant 0 : i32
    %c0_i32_1 = arith.constant 0 : i32
    return %c0_i32, %c0_i32_0 : i32, i32
  }
  func.func @transform_15(%arg0: i32) -> i32 {
    %c0_i32 = arith.constant 0 : i32
    %c0_i32_0 = arith.constant 0 : i32
    return %c0_i32 : i32
  }
  func.func @transform_16(%arg0: i32) -> (i32, i32) {
    %c0_i32 = arith.constant 0 : i32
    %c0_i32_0 = arith.constant 0 : i32
    %c0_i32_1 = arith.constant 0 : i32
    return %c0_i32, %c0_i32_0 : i32, i32
  }
}

</mosaic_0001>

<bundles_post_ra>
// kernel: tpu_custom_call.1
= control target key start
LH: loop header
LB: loop body
LE: loop exit
PB: predicated region body
PF: predicated region fallthrough
CT: control target
= control target key end

     0   :  { %s5210_s0 = inlined_call_operand.vmem [shape: s32[128,1], index: 0, kind: input, shape index: {}]   ;;  %s5211_s1 = inlined_call_operand.hbm [shape: s32[1,128], index: 1, kind: input, shape index: {}]   ;;  %s5212_s2 = inlined_call_operand.vmem [shape: f32[128,128], index: 2, kind: input, shape index: {}]   ;;  %s5213_s3 = inlined_call_operand.vmem [shape: bf16[128,8], index: 3, kind: input, shape index: {}]   ;;  %s5214_s4 = inlined_call_operand.hbm [shape: bf16[6,8,128], index: 4, kind: input, shape index: {}]   ;;  %s5215_s5 = inlined_call_operand.hbm [shape: f32[6], index: 5, kind: input, shape index: {}]   ;;  %s5216_s6 = inlined_call_operand.hbm [shape: bf16[6,128,128], index: 6, kind: input, shape index: {}]   ;;  %s5217_s7 = inlined_call_operand.vmem [shape: f32[6,2,128], index: 7, kind: input, shape index: {}]   ;;  %s5218_s8 = inlined_call_operand.hbm [shape: bf16[6,128,128], index: 8, kind: input, shape index: {}]   ;;  %s5219_s9 = inlined_call_operand.vmem [shape: bf16[128,128], index: 9, kind: input, shape index: {}]   ;;  %s5220_s10 = inlined_call_operand.hbm [shape: bf16[128,128], index: 10, kind: input, shape index: {}]   ;;  %s5221_s11 = inlined_call_operand.hbm [shape: bf16[128,128], index: 11, kind: input, shape index: {}]   ;;  %s5222_s12 = inlined_call_operand.vmem [shape: f32[3,128], index: 12, kind: input, shape index: {}]   ;;  %s5223_s13 = inlined_call_operand.hbm [shape: bf16[128,128], index: 13, kind: input, shape index: {}]   ;;  %s5224_s14 = inlined_call_operand.vmem [shape: f32[1,128], index: 14, kind: input, shape index: {}]   ;;  %s5225_s15 = inlined_call_operand.vmem [shape: f32[3], index: 15, kind: input, shape index: {}]   ;;  %s5226_s16 = inlined_call_operand.hbm [shape: f32[128,128], index: 16, kind: output, shape index: {}]  }
   0x1   :  { %5246 = sst [smem:[#allocation34_spill]] %s5210_s0 }
   0x2   :  { %5247 = sst [smem:[#allocation35_spill]] %s5212_s2 }
   0x3   :  { %5248 = sst [smem:[#allocation36_spill]] %s5213_s3 }
   0x4   :  { %5249 = sst [smem:[#allocation37_spill]] %s5214_s4 }
   0x5   :  { %5250 = sst [smem:[#allocation38_spill]] %s5219_s9 }
   0x6   :  { %5251 = sst [smem:[#allocation39_spill]] %s5220_s10 }
   0x7   :  { %5252 = sst [smem:[#allocation40_spill]] %s5221_s11 }
   0x8   :  { %5253 = sst [smem:[#allocation41_spill]] %s5222_s12 }
   0x9   :  { %5254 = sst [smem:[#allocation42_spill]] %s5224_s14 }
   0xa   :  { %5255 = sst [smem:[#allocation43_spill]] %s5226_s16 }
   0xb   :  { %21 = vsyncpa [#allocation6], 0 }
   0xc   :  { %22 = vsyncpa [#allocation11], 0 }
   0xd   :  { %24 = vsyncpa [#allocation11 + $0x1], 0 }
   0xe   :  { %25 = vsyncpa [#allocation8], 0 }
   0xf   :  { %26 = vsyncpa [#allocation15], 0 }
  0x10   :  { %28 = vsyncpa [#allocation15 + $0x1], 0 }
  0x11   :  { %29 = vsyncpa [#allocation18], 0 }
  0x12   :  { %30 = vsyncpa [#allocation9], 0 }
  0x13   :  { %31 = vsyncpa [#allocation7], 0  ;;  %s4399_s21 = smov 0   ;;  %s4401_s22 = smov 0  }
  0x14   :  { %s4403_s23 = smov 0   ;;  %s4405_s24 = smov 0  }
  0x15 LB: > { %5256 = sst [smem:[#allocation31_spill]] %s4292_s23  ;;  %s4298_s25 = smov [#allocation16]   ;;  %s4296_s24 = sphi %s4405_s24, %s5294_s24   ;;  %s4292_s23 = sphi %s4403_s23, %s5296_s23   ;;  %s4288_s22 = sphi %s4401_s22, %s5298_s22   ;;  %s4284_s21 = sphi %s4399_s21, %s5297_s21  }
  0x16   : > { %s463_s26 = sshll.u32 %s4298_s25, 4  ;;  %s4420_s27 = sadd.s32 4294967295, %s4296_s24   ;;  %s464_s26 = int_to_ptr.vmem [resolvable:$true] %s463_s26 }
  0x17   : > { %p3132_p0 = scmp.ge.s32.totalorder %s4296_s24, 1  ;;  %p5236_p1 = scmp.eq.s32.totalorder %s4420_s27, 0 }
  0x18   : > { %p419_p2 = scmp.lt.s32.totalorder %s4296_s24, 7  ;;  %s4299_s29 = smov [#allocation17]  }
  0x19   : > { %s476_s30 = sshll.u32 %s4299_s29, 4  ;;  %s4003_s18 = scalar_lea.vmem %s464_s26, 1024  ;;  %s477_s30 = int_to_ptr.vmem [resolvable:$true] %s476_s30 }
  0x1a   : > { %p4426_p4 = pnand %p3132_p0, %p419_p2  ;;  %p4004_p8 = scmp.ne.s32.totalorder %s464_s26, %s4003_s18 }
  0x1b   : > { %p4011_p11 = scmp.lt.s32.totalorder %s464_s26, %s464_s26  ;;  %p4012_p12 = scmp.lt.s32.totalorder %s4003_s18, %s4003_s18 }
  0x1c   : > { %s5257_s28 = scalar_select %p4426_p4, 1, 0 }
  0x1d   : > { %p3829_p5 = pneg %p4426_p4  ;;  %p4013_p13 = por %p4012_p12, %p4011_p11 }
  0x1f   : > { %p4434_p6 = pnand %p3829_p5, %p5236_p1 }
  0x21   : > { %s5258_s0 = scalar_select %p4434_p6, 1, 0 }
  0x22   : > { %p4440_p7 = pneg %p4434_p6 }
  0x24   : > { %s5259_s17 = scalar_select %p4440_p7, 1, 0 }
  0x25   : > { %p4006_p9 = pnand %p4004_p8, %p4440_p7 }
  0x27   : > { %p4007_p10 = pneg %p4006_p9 }
  0x29   : > { %p4014_p0 = pnand %p4013_p13, %p4007_p10 }
  0x2b   : > { %4017 = shalt.err (!%p4014_p0)
}
  0x2c   : > { %s5228_s19 = smov 64   ;;  %s5230_s20 = smov 4  }
  0x2d   : > { %s5260_s10 = sld [smem:[#allocation39_spill]]  ;;  %s4029_s16 = scalar_lea.vmem %s477_s30, 1024 }
  0x2e   : > { %p4030_p2 = scmp.ne.s32.totalorder %s477_s30, %s4029_s16  ;;  %p4037_p9 = scmp.lt.s32.totalorder %s477_s30, %s477_s30 }
  0x2f   : > { %p4038_p10 = scmp.lt.s32.totalorder %s4029_s16, %s4029_s16 }
  0x30   : > { %p4032_p5 = pnand %p4030_p2, %p4440_p7 }
  0x31   : > { %p4039_p11 = por %p4038_p10, %p4037_p9 }
  0x32   : > { %p4033_p8 = pneg %p4032_p5 }
  0x33   : > { %3838 = dma.hbm_to_vmem [thread:$0]  (!%p4434_p6), %s5260_s10, 1024, %s464_s26, [#allocation15], %s5228_s19, %s5228_s19, %s5230_s20  }
  0x34   : > { %p4040_p12 = pnand %p4039_p11, %p4033_p8 }
  0x36   : > { %4043 = shalt.err (!%p4040_p12)
}
  0x37   : > { %s5261_s11 = sld [smem:[#allocation40_spill]]  ;;  %s4465_s16 = sadd.s32 1, %s4296_s24  }
  0x38   : > { %5262 = sst [smem:[#allocation32_spill]] %s4465_s16  ;;  %s128_s26 = sadd.s32 1, %s4292_s23 }
  0x39   : > { %s125_s14 = ssub.s32 %s4296_s24, %s4465_s16  ;;  %p135_p13 = scmp.ne.s32.totalorder %s4292_s23, %s4288_s22 }
  0x3a   : > { %p126_p0 = scmp.eq.s32.totalorder %s125_s14, 0  ;;  %p136_p2 = scmp.eq.s32.totalorder %s4296_s24, 0 }
  0x3b   : > { %p141_p5 = scmp.ne.s32.totalorder %s4288_s22, %s4284_s21  ;;  %p3864_p8 = scmp.lt.s32.totalorder %s4296_s24, 6 }
  0x3c   : > { %s4477_s25 = scalar_select %p126_p0, %s4292_s23, %s128_s26  }
  0x3d   : > { %3841 = dma.hbm_to_vmem [thread:$0]  (!%p4434_p6), %s5261_s11, 1024, %s477_s30, [#allocation18], %s5228_s19, %s5228_s19, %s5230_s20  }
  0x3e   : > { %5263 = sst [smem:[#allocation33_spill]] %s4477_s25  ;;  %p137_p9 = por %p136_p2, %p135_p13 }
  0x3f   : > { %p4481_p10 = por %p5236_p1, %p141_p5  ;;  %s522_s18 = sand.u32 1, %s4292_s23  }
  0x40   : > { %s3140_s19 = sshll.u32 %s522_s18, 2  ;;  %s3141_s20 = sshll.u32 %s4296_s24, 6 }
  0x41   : > { %s5264_s29 = scalar_select %p4481_p10, 1, 0 }
  0x42   : > { %s5265_s4 = sld [smem:[#allocation37_spill]]  ;;  %s524_s21 = scalar_lea.vmem [#allocation10], %s3140_s19 }
  0x43   : > { %s531_s26 = sshll.u32 %s524_s21, 4  ;;  %p4495_p11 = pnand %p3864_p8, %p137_p9  ;;  %s4493_s26 = int_to_ptr.vmem [resolvable:$true] %s531_s26 }
  0x44   : > { %s4499_s30 = sshll.u32 %s522_s18, 6  ;;  %s5267_s23 = sand.u32 1, %s4296_s24  }
  0x45   : > { %s4503_s16 = scalar_lea.sflag [#allocation11], %s5267_s23  ;;  %p4509_p13 = pneg %p4495_p11 }
  0x48   : > { %s4491_s14 = scalar_lea.hbm %s5265_s4, %s3141_s20  ;;  %s4049_s21 = scalar_lea.hbm %s5265_s4, 384 }
  0x49   : > { %s4044_s10 = scalar_lea.hbm %s4491_s14, 64  ;;  %p4050_p5 = scmp.lt.s32.totalorder %s4491_s14, %s5265_s4 }
  0x4a   : > { %p4045_p12 = scmp.ne.s32.totalorder %s4491_s14, %s4044_s10  ;;  %p4051_p8 = scmp.lt.s32.totalorder %s4049_s21, %s4044_s10 }
  0x4c   : > { %p4047_p0 = pnand %p4509_p13, %p4045_p12  ;;  %p4052_p9 = por %p4051_p8, %p4050_p5 }
  0x4e   : > { %p4048_p2 = pneg %p4047_p0 }
  0x50   : > { %p4053_p3 = pnand %p4052_p9, %p4048_p2 }
  0x52   : > { %4056 = shalt.err (!%p4053_p3)
}
  0x53   : > { %s4057_s23 = scalar_lea.vmem %s4493_s26, 64  ;;  %s4302_s9 = smov [#allocation10]  }
  0x54   : > { %p4058_p1 = scmp.ne.s32.totalorder %s4493_s26, %s4057_s23  ;;  %s4062_s19 = sshll.u32 %s4302_s9, 4  ;;  %s4063_s19 = int_to_ptr.vmem [resolvable:$false] %s4062_s19 }
  0x55   : > { %s4064_s20 = scalar_lea.vmem %s4063_s19, 128  ;;  %p4065_p10 = scmp.lt.s32.totalorder %s4493_s26, %s4063_s19 }
  0x56   : > { %p4060_p12 = pnand %p4058_p1, %p4509_p13  ;;  %p4066_p4 = scmp.lt.s32.totalorder %s4064_s20, %s4057_s23 }
  0x58   : > { %p4061_p0 = pneg %p4060_p12  ;;  %p4067_p6 = por %p4066_p4, %p4065_p10 }
  0x5a   : > { %p4068_p7 = pnand %p4067_p6, %p4061_p0 }
  0x5c   : > { %4071 = shalt.err (!%p4068_p7)
}
  0x5d   : > { %3851 = dma.hbm_to_vmem [thread:$0]  (!%p4495_p11), %s4491_s14, 64, %s4493_s26, %s4503_s16  }
  0x5e   : > { %s542_s12 = scalar_lea.vmem [#allocation13], %s4499_s30  ;;  %s570_s9 = scalar_lea.vmem [#allocation14], %s4499_s30 }
  0x5f   : > { %s549_s10 = sshll.u32 %s542_s12, 4  ;;  %s577_s21 = sshll.u32 %s570_s9, 4  ;;  %s4533_s10 = int_to_ptr.vmem [resolvable:$true] %s549_s10  ;;  %s4536_s21 = int_to_ptr.vmem [resolvable:$true] %s577_s21 }
  0x60   : > { %s4303_s18 = smov [#allocation5]   ;;  %p5269_p3 = scmp.ne.s32.totalorder %s5259_s17, 0 }
  0x61   : > { %s435_s23 = sshll.u32 %s4303_s18, 4  ;;  %s436_s23 = int_to_ptr.vmem [resolvable:$true] %s435_s23 }
  0x62   : > { %s4083_s19 = scalar_lea.vmem %s436_s23, 16  ;;  %s4090_s20 = scalar_lea.vmem %s436_s23, 32 }
  0x63   : > { %p4084_p1 = scmp.ne.s32.totalorder %s436_s23, %s4083_s19  ;;  %p4091_p7 = scmp.lt.s32.totalorder %s436_s23, %s436_s23 }
  0x64   : > { %p4092_p10 = scmp.lt.s32.totalorder %s4090_s20, %s4083_s19 }
  0x65   : > { %p4086_p4 = pnand %p4084_p1, %p5269_p3 }
  0x66   : > { %p4093_p2 = por %p4092_p10, %p4091_p7 }
  0x67   : > { %p4087_p6 = pneg %p4086_p4 }
  0x69   : > { %p4094_p5 = pnand %p4093_p2, %p4087_p6 }
  0x6b   : > { %4097 = shalt.err (!%p4094_p5)
}
  0x6c   : > { %p5270_p8 = scmp.ne.s32.totalorder %s5258_s0, 0  ;;  %s4304_s26 = smov [#allocation12]  }
  0x6d   : > { %s4305_s18 = smov [#allocation19]   ;;  %s509_s3 = sshll.u32 %s5225_s15, 4  ;;  %s510_s3 = int_to_ptr.vmem [resolvable:$true] %s509_s3 }
  0x6e   : > { %3832 = dma.hbm_to_vmem [thread:$0]  (!%p5270_p8), %s5211_s1, 16, %s436_s23, [#allocation6]  }
  0x6f   : > { %3835 = dma.hbm_to_smem (!%p5270_p8), %s5215_s5, 16, %s4304_s26, [#allocation8]  }
  0x70   : > { %s492_s4 = sshll.u32 %s4305_s18, 4  ;;  %s493_s4 = int_to_ptr.vmem [resolvable:$true] %s492_s4 }
  0x71   : > { %s4120_s2 = scalar_lea.vmem %s493_s4, 1024  ;;  %p4128_p1 = scmp.lt.s32.totalorder %s493_s4, %s493_s4 }
  0x72   : > { %p4121_p9 = scmp.ne.s32.totalorder %s493_s4, %s4120_s2  ;;  %p4129_p4 = scmp.lt.s32.totalorder %s4120_s2, %s4120_s2 }
  0x74   : > { %p4123_p12 = pnand %p4121_p9, %p5269_p3  ;;  %p4130_p6 = por %p4129_p4, %p4128_p1 }
  0x76   : > { %p4124_p0 = pneg %p4123_p12 }
  0x78   : > { %p4131_p7 = pnand %p4130_p6, %p4124_p0 }
  0x7a   : > { %4134 = shalt.err (!%p4131_p7)
}
  0x7b   : > { %s5271_s23 = smov 4   ;;  %s5272_s30 = smov 64  }
  0x7c   : > { %3844 = dma.hbm_to_vmem [thread:$0]  (!%p5270_p8), %s5223_s13, 1024, %s493_s4, [#allocation18], %s5272_s30, %s5272_s30, %s5271_s23  }
  0x7d   : > { %s3287_s12 = sshll.u32 %s4296_s24, 10  ;;  %s4135_s9 = scalar_lea.vmem %s510_s3, 16 }
  0x7e   : > { %p4136_p10 = scmp.ne.s32.totalorder %s510_s3, %s4135_s9  ;;  %p4143_p9 = scmp.lt.s32.totalorder %s510_s3, %s510_s3 }
  0x7f   : > { %p4144_p12 = scmp.lt.s32.totalorder %s4135_s9, %s4135_s9 }
  0x80   : > { %p4138_p2 = pnand %p4136_p10, %p5269_p3 }
  0x81   : > { %p4145_p0 = por %p4144_p12, %p4143_p9 }
  0x82   : > { %p4139_p5 = pneg %p4138_p2 }
  0x84   : > { %p4146_p1 = pnand %p4145_p0, %p4139_p5 }
  0x86   : > { %4149 = shalt.err (!%p4146_p1)
}
  0x87   : > { %s4306_s2 = smov [#allocation20]   ;;  %s4571_s4 = scalar_lea.hbm %s5216_s6, %s3287_s12 }
  0x88   : > { %3847 = dma.vmem_to_smem (!%p5270_p8), %s510_s3, 16, %s4306_s2, [#allocation9]  }
  0x89   : > { %s4576_s17 = scalar_lea.hbm %s5218_s8, %s3287_s12  ;;  %s4150_s26 = scalar_lea.hbm %s4571_s4, 1024 }
  0x8a   : > { %p4151_p3 = scmp.ne.s32.totalorder %s4571_s4, %s4150_s26  ;;  %s4155_s9 = scalar_lea.hbm %s5216_s6, 6144 }
  0x8b   : > { %p4156_p8 = scmp.lt.s32.totalorder %s4571_s4, %s5216_s6  ;;  %p4157_p7 = scmp.lt.s32.totalorder %s4155_s9, %s4150_s26 }
  0x8c   : > { %p4153_p4 = pnand %p4151_p3, %p4509_p13 }
  0x8d   : > { %p4158_p10 = por %p4157_p7, %p4156_p8 }
  0x8e   : > { %p4154_p6 = pneg %p4153_p4 }
  0x90   : > { %p4159_p2 = pnand %p4158_p10, %p4154_p6 }
  0x92   : > { %4162 = shalt.err (!%p4159_p2)
}
  0x93   : > { %s4163_s12 = scalar_lea.vmem %s4533_s10, 1024  ;;  %s4307_s19 = smov [#allocation13]  }
  0x94   : > { %p4164_p5 = scmp.ne.s32.totalorder %s4533_s10, %s4163_s12  ;;  %s4168_s20 = sshll.u32 %s4307_s19, 4  ;;  %s4169_s20 = int_to_ptr.vmem [resolvable:$false] %s4168_s20 }
  0x95   : > { %s4170_s14 = scalar_lea.vmem %s4169_s20, 2048  ;;  %p4171_p0 = scmp.lt.s32.totalorder %s4533_s10, %s4169_s20 }
  0x96   : > { %p4166_p9 = pnand %p4164_p5, %p4509_p13  ;;  %p4172_p1 = scmp.lt.s32.totalorder %s4170_s14, %s4163_s12 }
  0x98   : > { %p4167_p12 = pneg %p4166_p9  ;;  %p4173_p3 = por %p4172_p1, %p4171_p0 }
  0x9a   : > { %p4174_p4 = pnand %p4173_p3, %p4167_p12 }
  0x9c   : > { %4177 = shalt.err (!%p4174_p4)
}
  0x9d   : > { %3854 = dma.hbm_to_vmem [thread:$0]  (!%p4495_p11), %s4571_s4, 1024, %s4533_s10, %s4503_s16, %s5272_s30, %s5272_s30, %s5271_s23  }
  0x9e   : > { %s5273_s26 = sand.u32 1, %s4296_s24   ;;  %s4178_s3 = scalar_lea.hbm %s4576_s17, 1024 }
  0x9f   : > { %s567_s0 = scalar_lea.sflag [#allocation15], %s5273_s26  ;;  %p4179_p6 = scmp.ne.s32.totalorder %s4576_s17, %s4178_s3 }
  0xa0   : > { %s4183_s18 = scalar_lea.hbm %s5218_s8, 6144  ;;  %p4184_p10 = scmp.lt.s32.totalorder %s4576_s17, %s5218_s8 }
  0xa1   : > { %p4181_p8 = pnand %p4179_p6, %p4509_p13  ;;  %p4185_p2 = scmp.lt.s32.totalorder %s4183_s18, %s4178_s3 }
  0xa3   : > { %p4182_p7 = pneg %p4181_p8  ;;  %p4186_p5 = por %p4185_p2, %p4184_p10 }
  0xa5   : > { %p4187_p9 = pnand %p4186_p5, %p4182_p7 }
  0xa7   : > { %4190 = shalt.err (!%p4187_p9)
}
  0xa8   : > { %s4191_s24 = scalar_lea.vmem %s4536_s21, 1024  ;;  %s4308_s16 = smov [#allocation14]  }
  0xa9   : > { %p4192_p12 = scmp.ne.s32.totalorder %s4536_s21, %s4191_s24  ;;  %s4196_s10 = sshll.u32 %s4308_s16, 4  ;;  %s4197_s10 = int_to_ptr.vmem [resolvable:$false] %s4196_s10 }
  0xaa   : > { %s4198_s4 = scalar_lea.vmem %s4197_s10, 2048  ;;  %p4199_p3 = scmp.lt.s32.totalorder %s4536_s21, %s4197_s10 }
  0xab   : > { %p4194_p0 = pnand %p4192_p12, %p4509_p13  ;;  %p4200_p4 = scmp.lt.s32.totalorder %s4198_s4, %s4191_s24 }
  0xad   : > { %p4195_p1 = pneg %p4194_p0  ;;  %p4201_p6 = por %p4200_p4, %p4199_p3 }
  0xaf   : > { %p4202_p8 = pnand %p4201_p6, %p4195_p1 }
  0xb1   : > { %4205 = shalt.err (!%p4202_p8)
}
  0xb2   : > { %3857 = dma.hbm_to_vmem [thread:$0]  (!%p4495_p11), %s4576_s17, 1024, %s4536_s21, %s567_s0, %s5272_s30, %s5272_s30, %s5271_s23  }
  0xb3   : > { %p5274_p13 = scmp.ne.s32.totalorder %s5257_s28, 0 }
  0xb4   : > { %p5275_p7 = scmp.eq.s32.totalorder (!%p5274_p13), %s4420_s27, 0 }
  0xb5   : > { %589 = sbr.rel (%p5274_p13) target bundleno = 2235 (0x8bb), region = 84 }
  0xba   : > { %4247 = dma.done.wait (%p5275_p7), [#allocation6], 16   ;;  %p5276_p10 = pmov %p5275_p7 }
  0xbb   : > { %s595_s11 = sand.u32 1, %s4420_s27   ;;  %s597_s25 = sand.u32 1, %s4288_s22  }
  0xbc   : > { %4249 = vsyncadd (%p5276_p10), [#allocation6], 4294967280  ;;  %s4635_s20 = sshll.u32 %s597_s25, 2  ;;  %s596_s14 = scalar_lea.sflag [#allocation11], %s595_s11 }
  0xbd   : > { %s599_s26 = scalar_lea.vmem [#allocation10], %s4635_s20  ;;  %p5277_p11 = scmp.ne.s32.totalorder %s5264_s29, 0 }
  0xbf   : > { %4251 = dma.done.wait (%p5277_p11), %s596_s14, 64  }
  0xc0   : > { %4253 = vsyncadd (%p5277_p11), %s596_s14, 4294967232  ;;  %p5278_p2 = pmov %p5275_p7 }
  0xc2   : > { %4255 = dma.done.wait (%p5278_p2), [#allocation8], 16   ;;  %p5279_p5 = pmov %p5278_p2 }
  0xc3   : > { %s3152_s28 = sshll.u32 %s597_s25, 6 }
  0xc4   : > { %4257 = vsyncadd (%p5279_p5), [#allocation8], 4294967280  ;;  %s4646_s21 = scalar_lea.vmem [#allocation13], %s3152_s28 }
  0xc5   : > { %4259 = dma.done.wait (%p5277_p11), %s596_s14, 1024  }
  0xc6   : > { %4261 = vsyncadd (%p5277_p11), %s596_s14, 4294966272  ;;  %s618_s23 = scalar_lea.sflag [#allocation15], %s595_s11  ;;  %s4652_s30 = scalar_lea.vmem [#allocation14], %s3152_s28 }
  0xc7   : > { %4263 = dma.done.wait (%p5277_p11), %s618_s23, 1024  }
  0xc8   : > { %4265 = vsyncadd (%p5277_p11), %s618_s23, 4294966272  ;;  %p5280_p9 = pmov %p5278_p2 }
  0xc9   : > { %p5281_p12 = pmov %p5278_p2 }
  0xca   : > { %4267 = dma.done.wait (%p5280_p9), [#allocation15], 1024  }
  0xcb   : > { %4269 = vsyncadd (%p5281_p12), [#allocation15], 4294966272  ;;  %p5282_p0 = pmov %p5278_p2 }
  0xcd   : > { %4271 = dma.done.wait (%p5282_p0), [#allocation18], 2048   ;;  %p5283_p1 = pmov %p5282_p0 }
  0xce   : > { %p5284_p3 = pmov %p5282_p0 }
  0xcf   : > { %4273 = vsyncadd (%p5283_p1), [#allocation18], 4294965248 }
  0xd0   : > { %4275 = dma.done.wait (%p5284_p3), [#allocation9], 16   ;;  %p5285_p4 = pmov %p5282_p0 }
  0xd2   : > { %4277 = vsyncadd (%p5285_p4), [#allocation9], 4294967280 }
  0xd3   : > { %642 = sfence }
  0xd4   : > { %p696_p6 = scmp.lt.s32.totalorder %s4420_s27, 5  ;;  %p5286_p8 = scmp.ne.s32.totalorder %s4420_s27, 0 }
  0xd5   : > { %s5287_s12 = sld [smem:[#allocation34_spill]] (!%p5286_p8) }
  0xd6   : > { %s697_s29 = scalar_select %p696_p6, %s4420_s27, 5 }
  0xd7   : > { %704 = sbr.rel (%p5286_p8) target bundleno = 379 (0x17b), region = 124  ;;  %s5288_s19 = sld [smem:[#allocation35_spill]] (!%p5286_p8) }
  0xd8   : > { %s3158_s17 = sshll.u32 %s697_s29, 1 }
  0xd9   : > { %s4675_s9 = scalar_lea.vmem %s5217_s7, %s3158_s17 }
  0xdc   : > { %v741_v0 = vld [vmem:[%s5287_s12 + $0x10] sm:$0xff]  ;;  %v739_v1 = vld [vmem:[%s5287_s12] sm:$0xff]  ;;  %v737_v2 = vlaneseq  ;;  %v4309_v3 = vmov 0   ;;  %v742_v5 = vld [vmem:[%s5287_s12 + $0x18] sm:$0xff]  ;;  %v4310_v25 = vmov 0.0  }
  0xdd   : > { %3919 = vset.pattern.permute.xlu1 %v4309_v3  ;;  %3918 = vset.pattern.permute.xlu0 %v4309_v3  ;;  %v740_v6 = vld [vmem:[%s5287_s12 + $0x8] sm:$0xff]  ;;  %v3176_v9 = vld [vmem:[#allocation5] ss:$0 sm:$0xff]  ;;  %v746_v27 = vld [vmem:[%s5287_s12 + $0x38] sm:$0xff] }
  0xde   : > { %762 = vperm.xlu1 %3919, %v741_v0   ;;  %756 = vperm.xlu0 %3918, %v739_v1   ;;  %v916_v4 = vshrl.u32 %v737_v2, 7  ;;  %v744_v18 = vld [vmem:[%s5287_s12 + $0x28] sm:$0xff]  ;;  %v743_v19 = vld [vmem:[%s5287_s12 + $0x20] sm:$0xff]  ;;  %v745_v28 = vld [vmem:[%s5287_s12 + $0x30] sm:$0xff] }
  0xdf   : > { %v748_v39 = vld [vmem:[%s5287_s12 + $0x48] sm:$0xff]  ;;  %v747_v40 = vld [vmem:[%s5287_s12 + $0x40] sm:$0xff]  ;;  %v750_v54 = vld [vmem:[%s5287_s12 + $0x58] sm:$0xff] }
  0xe0   : > { %v917_v7 = vadd.s32 8, %v916_v4  ;;  %v918_v8 = vadd.s32 16, %v916_v4  ;;  %v919_v10 = vadd.s32 24, %v916_v4  ;;  %v920_v11 = vadd.s32 32, %v916_v4  ;;  %v749_v55 = vld [vmem:[%s5287_s12 + $0x50] sm:$0xff]  ;;  %v752_v56 = vld [vmem:[%s5287_s12 + $0x68] sm:$0xff] }
  0xe1   : > { %v921_v12 = vadd.s32 40, %v916_v4  ;;  %v922_v13 = vadd.s32 48, %v916_v4  ;;  %v923_v14 = vadd.s32 56, %v916_v4  ;;  %v924_v15 = vadd.s32 64, %v916_v4  ;;  %v751_v57 = vld [vmem:[%s5287_s12 + $0x60] sm:$0xff]  ;;  %v754_v58 = vld [vmem:[%s5287_s12 + $0x78] sm:$0xff] }
  0xe2   : > { %765 = vperm.xlu1 %3919, %v742_v5   ;;  %759 = vperm.xlu0 %3918, %v740_v6   ;;  %v925_v16 = vadd.s32 72, %v916_v4  ;;  %v926_v17 = vadd.s32 80, %v916_v4  ;;  %v927_v20 = vadd.s32 88, %v916_v4  ;;  %v928_v21 = vadd.s32 96, %v916_v4  ;;  %v753_v59 = vld [vmem:[%s5287_s12 + $0x70] sm:$0xff]  ;;  %v705_v60 = vld [vmem:[%s5288_s19] sm:$0xff] }
  0xe3   : > { %v929_v22 = vadd.s32 104, %v916_v4  ;;  %v930_v23 = vadd.s32 112, %v916_v4  ;;  %v931_v24 = vadd.s32 120, %v916_v4  ;;  %vm937_vm0 = vcmp.eq.s32.totalorder %v3176_v9, %v916_v4  ;;  %v706_v61 = vld [vmem:[%s5288_s19 + $0x8] sm:$0xff]  ;;  %v707_v62 = vld [vmem:[%s5288_s19 + $0x10] sm:$0xff]  ;;  %v708_v63 = vld [vmem:[%s5288_s19 + $0x18] sm:$0xff] }
  0xe4   : > { %vm938_vm1 = vcmp.eq.s32.totalorder %v3176_v9, %v917_v7  ;;  %vm939_vm2 = vcmp.eq.s32.totalorder %v3176_v9, %v918_v8  ;;  %vm940_vm3 = vcmp.eq.s32.totalorder %v3176_v9, %v919_v10  ;;  %vm941_vm4 = vcmp.eq.s32.totalorder %v3176_v9, %v920_v11  ;;  %v709_v0 = vld [vmem:[%s5288_s19 + $0x20] sm:$0xff]  ;;  %v710_v1 = vld [vmem:[%s5288_s19 + $0x28] sm:$0xff]  ;;  %721 = vst [vmem:[#allocation2 + $0x30] sm:$0xff] %v705_v60  ;;  %v711_v3 = vld [vmem:[%s5288_s19 + $0x30] sm:$0xff] }
  0xe5   : > { %vm942_vm5 = vcmp.eq.s32.totalorder %v3176_v9, %v921_v12  ;;  %vm943_vm6 = vcmp.eq.s32.totalorder %v3176_v9, %v922_v13  ;;  %vm944_vm7 = vcmp.eq.s32.totalorder %v3176_v9, %v923_v14  ;;  %vm945_vm8 = vcmp.eq.s32.totalorder %v3176_v9, %v924_v15  ;;  %722 = vst [vmem:[#allocation2] sm:$0xff] %v706_v61  ;;  %v712_v4 = vld [vmem:[%s5288_s19 + $0x38] sm:$0xff]  ;;  %v713_v5 = vld [vmem:[%s5288_s19 + $0x40] sm:$0xff]  ;;  %v714_v6 = vld [vmem:[%s5288_s19 + $0x48] sm:$0xff] }
  0xe6   : > { %771 = vperm.xlu1 %3919, %v744_v18   ;;  %768 = vperm.xlu0 %3918, %v743_v19   ;;  %vm946_vm9 = vcmp.eq.s32.totalorder %v3176_v9, %v925_v16  ;;  %v953_v26 = vsel %vm937_vm0, 1.0, %v4310_v25  ;;  %vm947_vm10 = vcmp.eq.s32.totalorder %v3176_v9, %v926_v17  ;;  %vm948_vm11 = vcmp.eq.s32.totalorder %v3176_v9, %v927_v20  ;;  %v715_v7 = vld [vmem:[%s5288_s19 + $0x50] sm:$0xff]  ;;  %v716_v8 = vld [vmem:[%s5288_s19 + $0x58] sm:$0xff]  ;;  %v718_v10 = vld [vmem:[%s5288_s19 + $0x68] sm:$0xff] }
  0xe7   : > { %vm949_vm12 = vcmp.eq.s32.totalorder %v3176_v9, %v928_v21  ;;  %vm950_vm13 = vcmp.eq.s32.totalorder %v3176_v9, %v929_v22  ;;  %vm951_vm14 = vcmp.eq.s32.totalorder %v3176_v9, %v930_v23  ;;  %vm952_vm15 = vcmp.eq.s32.totalorder %v3176_v9, %v931_v24  ;;  %723 = vst [vmem:[#allocation2 + $0x58] sm:$0xff] %v707_v62  ;;  %v717_v9 = vld [vmem:[%s5288_s19 + $0x60] sm:$0xff]  ;;  %v719_v11 = vld [vmem:[%s5288_s19 + $0x70] sm:$0xff]  ;;  %v720_v12 = vld [vmem:[%s5288_s19 + $0x78] sm:$0xff] }
  0xe8   : > { %v954_v29 = vsel %vm938_vm1, 1.0, %v4310_v25  ;;  %v955_v30 = vsel %vm939_vm2, 1.0, %v4310_v25  ;;  %v956_v31 = vsel %vm940_vm3, 1.0, %v4310_v25  ;;  %v957_v32 = vsel %vm941_vm4, 1.0, %v4310_v25  ;;  %724 = vst [vmem:[#allocation2 + $0x18] sm:$0xff] %v708_v63  ;;  %725 = vst [vmem:[#allocation2 + $0x50] sm:$0xff] %v709_v0 }
  0xe9   : > { %v958_v33 = vsel %vm942_vm5, 1.0, %v4310_v25  ;;  %v959_v34 = vsel %vm943_vm6, 1.0, %v4310_v25  ;;  %v960_v35 = vsel %vm944_vm7, 1.0, %v4310_v25  ;;  %v961_v36 = vsel %vm945_vm8, 1.0, %v4310_v25  ;;  %726 = vst [vmem:[#allocation2 + $0x68] sm:$0xff] %v710_v1  ;;  %727 = vst [vmem:[#allocation2 + $0x8] sm:$0xff] %v711_v3 }
  0xea   : > { %777 = vperm.xlu1 %3919, %v746_v27   ;;  %774 = vperm.xlu0 %3918, %v745_v28   ;;  %v962_v37 = vsel %vm946_vm9, 1.0, %v4310_v25  ;;  %v963_v38 = vsel %vm947_vm10, 1.0, %v4310_v25  ;;  %v964_v41 = vsel %vm948_vm11, 1.0, %v4310_v25  ;;  %v965_v42 = vsel %vm949_vm12, 1.0, %v4310_v25  ;;  %728 = vst [vmem:[#allocation2 + $0x48] sm:$0xff] %v712_v4  ;;  %729 = vst [vmem:[#allocation2 + $0x40] sm:$0xff] %v713_v5 }
  0xeb   : > { %v966_v43 = vsel %vm950_vm13, 1.0, %v4310_v25  ;;  %v967_v44 = vsel %vm951_vm14, 1.0, %v4310_v25  ;;  %v968_v45 = vsel %vm952_vm15, 1.0, %v4310_v25  ;;  %v3346_v46 = vpack.c.bf16 %v954_v29, %v953_v26  ;;  %730 = vst [vmem:[#allocation2 + $0x20] sm:$0xff] %v714_v6  ;;  %731 = vst [vmem:[#allocation2 + $0x10] sm:$0xff] %v715_v7 }
  0xec   : > { %v3349_v47 = vpack.c.bf16 %v956_v31, %v955_v30  ;;  %v3352_v48 = vpack.c.bf16 %v958_v33, %v957_v32  ;;  %v3355_v49 = vpack.c.bf16 %v960_v35, %v959_v34  ;;  %v3358_v50 = vpack.c.bf16 %v962_v37, %v961_v36  ;;  %732 = vst [vmem:[#allocation2 + $0x38] sm:$0xff] %v716_v8 }
  0xed   : > { %v3361_v51 = vpack.c.bf16 %v964_v41, %v963_v38  ;;  %v3364_v52 = vpack.c.bf16 %v966_v43, %v965_v42  ;;  %3347 = vst [vmem:[#allocation4] sm:$0xff] %v3346_v46   ;;  %v3367_v53 = vpack.c.bf16 %v968_v45, %v967_v44  ;;  %733 = vst [vmem:[#allocation2 + $0x60] sm:$0xff] %v717_v9  ;;  %v4808_v13 = vand.u32 127, %v737_v2 }
  0xee   : > { %783 = vperm.xlu1 %3919, %v748_v39   ;;  %780 = vperm.xlu0 %3918, %v747_v40   ;;  %3376 = vst [vmem:[#allocation4 + $0x8] sm:$0xff] %v3349_v47   ;;  %3377 = vst [vmem:[#allocation4 + $0x10] sm:$0xff] %v3352_v48  }
  0xef   : > { %3378 = vst [vmem:[#allocation4 + $0x18] sm:$0xff] %v3355_v49   ;;  %3379 = vst [vmem:[#allocation4 + $0x20] sm:$0xff] %v3358_v50  }
  0xf0   : > { %3380 = vst [vmem:[#allocation4 + $0x28] sm:$0xff] %v3361_v51   ;;  %3381 = vst [vmem:[#allocation4 + $0x30] sm:$0xff] %v3364_v52  }
  0xf1   : > { %3382 = vst [vmem:[#allocation4 + $0x38] sm:$0xff] %v3367_v53   ;;  %734 = vst [vmem:[#allocation2 + $0x70] sm:$0xff] %v718_v10 }
  0xf2   : > { %789 = vperm.xlu1 %3919, %v750_v54   ;;  %786 = vperm.xlu0 %3918, %v749_v55   ;;  %735 = vst [vmem:[#allocation2 + $0x78] sm:$0xff] %v719_v11  ;;  %736 = vst [vmem:[#allocation2 + $0x28] sm:$0xff] %v720_v12 }
  0xf6   : > { %795 = vperm.xlu1 %3919, %v752_v56   ;;  %792 = vperm.xlu0 %3918, %v751_v57  }
  0xfa   : > { %801 = vperm.xlu1 %3919, %v754_v58   ;;  %798 = vperm.xlu0 %3918, %v753_v59  }
 0x159   : > { %v763_v14 = vpop.permute.xlu1 %762  ;;  %v757_v15 = vpop.permute.xlu0 %756 }
 0x15a   : > { %vm805_vm0 = vcmp.eq.s32.totalorder %v763_v14, %v4808_v13  ;;  %vm803_vm1 = vcmp.eq.s32.totalorder %v757_v15, %v4808_v13 }
 0x15b   : > { %v821_v18 = vsel %vm805_vm0, 1.0, %v4310_v25  ;;  %v819_v19 = vsel %vm803_vm1, 1.0, %v4310_v25 }
 0x15d   : > { %v766_v16 = vpop.permute.xlu1 %765  ;;  %v760_v17 = vpop.permute.xlu0 %759 }
 0x15e   : > { %vm806_vm2 = vcmp.eq.s32.totalorder %v766_v16, %v4808_v13  ;;  %vm804_vm3 = vcmp.eq.s32.totalorder %v760_v17, %v4808_v13 }
 0x15f   : > { %v822_v20 = vsel %vm806_vm2, 1.0, %v4310_v25  ;;  %v820_v2 = vsel %vm804_vm3, 1.0, %v4310_v25 }
 0x160   : > { %v3325_v21 = vpack.c.bf16 %v822_v20, %v821_v18  ;;  %v3322_v22 = vpack.c.bf16 %v820_v2, %v819_v19 }
 0x161   : > { %v772_v23 = vpop.permute.xlu1 %771  ;;  %v769_v24 = vpop.permute.xlu0 %768 }
 0x162   : > { %3369 = vst [vmem:[#allocation3 + $0x8] sm:$0xff] %v3325_v21   ;;  %3323 = vst [vmem:[#allocation3] sm:$0xff] %v3322_v22   ;;  %vm808_vm4 = vcmp.eq.s32.totalorder %v772_v23, %v4808_v13  ;;  %vm807_vm5 = vcmp.eq.s32.totalorder %v769_v24, %v4808_v13 }
 0x163   : > { %v824_v26 = vsel %vm808_vm4, 1.0, %v4310_v25  ;;  %v823_v27 = vsel %vm807_vm5, 1.0, %v4310_v25 }
 0x164   : > { %v3328_v28 = vpack.c.bf16 %v824_v26, %v823_v27 }
 0x165   : > { %v778_v29 = vpop.permute.xlu1 %777  ;;  %v775_v30 = vpop.permute.xlu0 %774 }
 0x166   : > { %3370 = vst [vmem:[#allocation3 + $0x10] sm:$0xff] %v3328_v28   ;;  %vm810_vm6 = vcmp.eq.s32.totalorder %v778_v29, %v4808_v13  ;;  %vm809_vm7 = vcmp.eq.s32.totalorder %v775_v30, %v4808_v13 }
 0x167   : > { %v826_v31 = vsel %vm810_vm6, 1.0, %v4310_v25  ;;  %v825_v32 = vsel %vm809_vm7, 1.0, %v4310_v25 }
 0x168   : > { %v3331_v33 = vpack.c.bf16 %v826_v31, %v825_v32 }
 0x169   : > { %v784_v34 = vpop.permute.xlu1 %783  ;;  %v781_v35 = vpop.permute.xlu0 %780 }
 0x16a   : > { %3371 = vst [vmem:[#allocation3 + $0x18] sm:$0xff] %v3331_v33   ;;  %vm812_vm8 = vcmp.eq.s32.totalorder %v784_v34, %v4808_v13  ;;  %vm811_vm9 = vcmp.eq.s32.totalorder %v781_v35, %v4808_v13 }
 0x16b   : > { %v828_v36 = vsel %vm812_vm8, 1.0, %v4310_v25  ;;  %v827_v37 = vsel %vm811_vm9, 1.0, %v4310_v25 }
 0x16c   : > { %v3334_v38 = vpack.c.bf16 %v828_v36, %v827_v37 }
 0x16d   : > { %v790_v39 = vpop.permute.xlu1 %789  ;;  %v787_v40 = vpop.permute.xlu0 %786 }
 0x16e   : > { %3372 = vst [vmem:[#allocation3 + $0x20] sm:$0xff] %v3334_v38   ;;  %vm814_vm10 = vcmp.eq.s32.totalorder %v790_v39, %v4808_v13  ;;  %vm813_vm11 = vcmp.eq.s32.totalorder %v787_v40, %v4808_v13 }
 0x16f   : > { %v830_v41 = vsel %vm814_vm10, 1.0, %v4310_v25  ;;  %v829_v42 = vsel %vm813_vm11, 1.0, %v4310_v25 }
 0x170   : > { %v3337_v43 = vpack.c.bf16 %v830_v41, %v829_v42 }
 0x171   : > { %v796_v44 = vpop.permute.xlu1 %795  ;;  %v793_v45 = vpop.permute.xlu0 %792 }
 0x172   : > { %3373 = vst [vmem:[#allocation3 + $0x28] sm:$0xff] %v3337_v43   ;;  %vm816_vm12 = vcmp.eq.s32.totalorder %v796_v44, %v4808_v13  ;;  %vm815_vm13 = vcmp.eq.s32.totalorder %v793_v45, %v4808_v13 }
 0x173   : > { %v832_v46 = vsel %vm816_vm12, 1.0, %v4310_v25  ;;  %v831_v47 = vsel %vm815_vm13, 1.0, %v4310_v25 }
 0x174   : > { %v3340_v48 = vpack.c.bf16 %v832_v46, %v831_v47 }
 0x175   : > { %v802_v49 = vpop.permute.xlu1 %801  ;;  %v799_v50 = vpop.permute.xlu0 %798 }
 0x176   : > { %3374 = vst [vmem:[#allocation3 + $0x30] sm:$0xff] %v3340_v48   ;;  %vm818_vm14 = vcmp.eq.s32.totalorder %v802_v49, %v4808_v13  ;;  %vm817_vm15 = vcmp.eq.s32.totalorder %v799_v50, %v4808_v13 }
 0x177   : > { %v834_v51 = vsel %vm818_vm14, 1.0, %v4310_v25  ;;  %v833_v52 = vsel %vm817_vm15, 1.0, %v4310_v25 }
 0x178   : > { %v3343_v53 = vpack.c.bf16 %v834_v51, %v833_v52 }
 0x17a   : > { %3375 = vst [vmem:[#allocation3 + $0x38] sm:$0xff] %v3343_v53  }
 0x17b PF: > { %v4842_v54 = vld [vmem:[#allocation2 + $0x78] sm:$0xff]  ;;  %v4844_v55 = vld [vmem:[#allocation2 + $0x28] sm:$0xff]  ;;  %v4846_v56 = vld [vmem:[#allocation2 + $0x60] sm:$0xff]  ;;  %vm1155_vm0 = vcmask 1043456   ;;  %vm1130_vm1 = vcmask 64512   ;;  %s5289_s10 = sld [smem:[#allocation36_spill]] }
 0x17c   : > { %v1072_v57 = vpack.c.bf16 %v4844_v55, %v4842_v54  ;;  %v4850_v58 = vld [vmem:[#allocation2 + $0x70] sm:$0xff]  ;;  %v4856_v25 = vld [vmem:[#allocation2 + $0x38] sm:$0xff]  ;;  %v4858_v61 = vld [vmem:[#allocation2 + $0x40] sm:$0xff]  ;;  %s1602_s24 = sld [smem:[#allocation12 + %s4420_s27]]  ;;  %p3243_p13 = scmp.eq.s32.totalorder %s4420_s27, 5 }
 0x17d   : > { %v1071_v59 = vpack.c.bf16 %v4850_v58, %v4846_v56  ;;  %v4854_v60 = vld [vmem:[#allocation2 + $0x10] sm:$0xff]  ;;  %v4860_v62 = vld [vmem:[#allocation2 + $0x20] sm:$0xff]  ;;  %v4873_v5 = vld [vmem:[#allocation2 + $0x8] sm:$0xff] }
 0x17e   : > { %3538 = vmatprep.subr.bf16.mxu1 %v1072_v57  ;;  %v1089_v63 = vld [vmem:[%s599_s26] sm:$0xf]  ;;  %v1070_v0 = vpack.c.bf16 %v4856_v25, %v4854_v60  ;;  %v1069_v7 = vpack.c.bf16 %v4860_v62, %v4858_v61  ;;  %v4883_v10 = vld [vmem:[#allocation2 + $0x50] sm:$0xff]  ;;  %v4898_v16 = vld [vmem:[#allocation2 + $0x58] sm:$0xff] }
 0x17f   : > { %3539 = vmatpush3.bf16.msra.mxu1 %v1072_v57  ;;  %3794 = vmatprep.subr.msk.bf16.mxu0 %vm1155_vm0, %v1089_v63  ;;  %v1157_v1 = vsel %vm1155_vm0, %v1089_v63, 0  ;;  %v3922_v6 = vld [vmem:[#allocation3] sm:$0xff]   ;;  %v4877_v8 = vld [vmem:[#allocation2 + $0x48] sm:$0xff]  ;;  %v4901_v17 = vld [vmem:[#allocation2 + $0x18] sm:$0xff] }
 0x180   : > { %3540 = vmatprep.subr.bf16.mxu1 %v1071_v59  ;;  %3521 = vmatpush3.bf16.msra.mxu0 %v1157_v1  ;;  %v4885_v11 = vld [vmem:[#allocation2 + $0x68] sm:$0xff]  ;;  %v1068_v12 = vpack.c.bf16 %v4877_v8, %v4873_v5  ;;  %v4904_v18 = vld [vmem:[#allocation2 + $0x30] sm:$0xff]  ;;  %v4906_v19 = vld [vmem:[#allocation2] sm:$0xff]  ;;  %v1066_v2 = vpack.c.bf16 %v4901_v17, %v4898_v16 }
 0x181   : > { %v3920_v3 = vld [vmem:[%s5289_s10] sm:$0xff]   ;;  %v3921_v4 = vld [vmem:[%s5289_s10 + $0x8] sm:$0xff]   ;;  %3554 = vmatprep.mubr.bf16.mxu1 %v3922_v6  ;;  %v3924_v9 = vld [vmem:[%s5289_s10 + $0x10] sm:$0xff]   ;;  %v1067_v15 = vpack.c.bf16 %v4885_v11, %v4883_v10  ;;  %v1065_v22 = vpack.c.bf16 %v4906_v19, %v4904_v18 }
 0x182   : > { %3522 = vmatprep.mubr.msk.bf16.mxu0 %vm1130_vm1, %v3920_v3  ;;  %v3925_v13 = vld [vmem:[%s5289_s10 + $0x18] sm:$0xff]   ;;  %v3928_v14 = vld [vmem:[%s5289_s10 + $0x20] sm:$0xff]   ;;  %v3929_v20 = vld [vmem:[%s5289_s10 + $0x28] sm:$0xff]  }
 0x183   : > { %3541 = vmatpush3.bf16.msra.mxu1 %v1071_v59  ;;  %3523 = vmatmul.mubr.msk.bf16.vlgmr.msra.gmra.mxu0 %vm1130_vm1, %v3921_v4  ;;  %v3932_v21 = vld [vmem:[%s5289_s10 + $0x30] sm:$0xff]   ;;  %v3933_v23 = vld [vmem:[%s5289_s10 + $0x38] sm:$0xff]   ;;  %v3923_v24 = vld [vmem:[#allocation3 + $0x8] sm:$0xff]  }
 0x184   : > { %3542 = vmatprep.subr.bf16.mxu1 %v1070_v0  ;;  %3526 = vmatprep.mubr.msk.bf16.mxu0 %vm1130_vm1, %v3924_v9  ;;  %v3926_v26 = vld [vmem:[#allocation3 + $0x10] sm:$0xff]   ;;  %v3927_v27 = vld [vmem:[#allocation3 + $0x18] sm:$0xff]   ;;  %v3930_v28 = vld [vmem:[#allocation3 + $0x20] sm:$0xff]  }
 0x185   : > { %v3931_v29 = vld [vmem:[#allocation3 + $0x28] sm:$0xff]   ;;  %v3934_v30 = vld [vmem:[#allocation3 + $0x30] sm:$0xff]   ;;  %v3935_v31 = vld [vmem:[#allocation3 + $0x38] sm:$0xff]  }
 0x186   : > { %v3936_v32 = vld [vmem:[#allocation4] sm:$0xff]   ;;  %v3946_v35 = vld [vmem:[%s4646_s21 + $0x28] sm:$0xff]   ;;  %v3947_v36 = vld [vmem:[%s4646_s21 + $0x20] sm:$0xff]  }
 0x187   : > { %3543 = vmatpush3.bf16.msra.mxu1 %v1070_v0  ;;  %v3944_v33 = vld [vmem:[%s4646_s21 + $0x38] sm:$0xff]   ;;  %v3945_v34 = vld [vmem:[%s4646_s21 + $0x30] sm:$0xff]  }
 0x188   : > { %3544 = vmatprep.subr.bf16.mxu1 %v1069_v7  ;;  %v3948_v38 = vld [vmem:[%s4646_s21 + $0x18] sm:$0xff]  }
 0x18b   : > { %3545 = vmatpush3.bf16.msra.mxu1 %v1069_v7  ;;  %3527 = vmatmul.mubr.msk.bf16.gmra.mxu0 %vm1130_vm1, %v3925_v13 }
 0x18c   : > { %3546 = vmatprep.subr.bf16.mxu1 %v1068_v12  ;;  %3530 = vmatprep.mubr.msk.bf16.mxu0 %vm1130_vm1, %v3928_v14 }
 0x18f   : > { %3547 = vmatpush3.bf16.msra.mxu1 %v1068_v12 }
 0x190   : > { %3548 = vmatprep.subr.bf16.mxu1 %v1067_v15 }
 0x193   : > { %3549 = vmatpush3.bf16.msra.mxu1 %v1067_v15  ;;  %3531 = vmatmul.mubr.msk.bf16.gmra.mxu0 %vm1130_vm1, %v3929_v20 }
 0x194   : > { %3550 = vmatprep.subr.bf16.mxu1 %v1066_v2  ;;  %3534 = vmatprep.mubr.msk.bf16.mxu0 %vm1130_vm1, %v3932_v21 }
 0x197   : > { %3551 = vmatpush3.bf16.msra.mxu1 %v1066_v2 }
 0x198   : > { %3552 = vmatprep.subr.bf16.mxu1 %v1065_v22 }
 0x19b   : > { %3553 = vmatpush3.bf16.msra.mxu1 %v1065_v22  ;;  %3535 = vmatmul.mubr.msk.bf16.gmra.mxu0 %vm1130_vm1, %v3933_v23 }
 0x19c   : > { %3586 = vmatprep.mubr.bf16.mxu0 %v3936_v32  ;;  %3602 = vmatprep.subr.bf16.mxu1 %v3944_v33 }
 0x19e   : > { %3555 = vmatmul.mubr.bf16.vlgmr.msra.gmra.mxu1 %v3923_v24 }
 0x19f   : > { %3558 = vmatprep.mubr.bf16.mxu1 %v3926_v26  ;;  %3603 = vmatpush3.bf16.msra.mxu1 %v3944_v33 }
 0x1a0   : > { %3604 = vmatprep.subr.bf16.mxu1 %v3945_v34 }
 0x1a3   : > { %3605 = vmatpush3.bf16.msra.mxu1 %v3945_v34 }
 0x1a4   : > { %3606 = vmatprep.subr.bf16.mxu1 %v3946_v35 }
 0x1a6   : > { %3559 = vmatmul.mubr.bf16.gmra.mxu1 %v3927_v27 }
 0x1a7   : > { %3562 = vmatprep.mubr.bf16.mxu1 %v3930_v28  ;;  %3607 = vmatpush3.bf16.msra.mxu1 %v3946_v35 }
 0x1a8   : > { %3608 = vmatprep.subr.bf16.mxu1 %v3947_v36 }
 0x1ab   : > { %3609 = vmatpush3.bf16.msra.mxu1 %v3947_v36 }
 0x1ac   : > { %3610 = vmatprep.subr.bf16.mxu1 %v3948_v38 }
 0x1ae   : > { %3563 = vmatmul.mubr.bf16.gmra.mxu1 %v3931_v29 }
 0x1af   : > { %3566 = vmatprep.mubr.bf16.mxu1 %v3934_v30  ;;  %3611 = vmatpush3.bf16.msra.mxu1 %v3948_v38 }
 0x1b6   : > { %3567 = vmatmul.mubr.bf16.gmra.mxu1 %v3935_v31 }
 0x243   : > { %v4928_v37 = vpop.f32.mrf.mxu0 }
 0x245   : > { %v4931_v39 = vpop.f32.mrf.mxu0 }
 0x247   : > { %v4933_v40 = vpop.f32.mrf.mxu0 }
 0x249   : > { %v4935_v41 = vpop.f32.mrf.mxu0 }
 0x24b   : > { %v3528_v42 = vpop.f32.mrf.mxu0 }
 0x24d   : > { %v1209_v43 = vpop.f32.mrf.mxu0 }
 0x24f   : > { %v3529_v44 = vpop.f32.mrf.mxu0 }
 0x251   : > { %v1212_v45 = vpop.f32.mrf.mxu0 }
 0x253   : > { %v3532_v48 = vpop.f32.mrf.mxu0 }
 0x255   : > { %v1225_v51 = vpop.f32.mrf.mxu0 }
 0x257   : > { %v3533_v57 = vpop.f32.mrf.mxu0 }
 0x259   : > { %v1228_v0 = vpop.f32.mrf.mxu0 }
 0x25b   : > { %v3536_v3 = vpop.f32.mrf.mxu0 }
 0x25d   : > { %v1241_v7 = vpop.f32.mrf.mxu0 }
 0x25e   : > { %v3556_v46 = vpop.f32.mrf.mxu1 }
 0x25f   : > { %v3537_v13 = vpop.f32.mrf.mxu0 }
 0x260   : > { %v4937_v47 = vpop.f32.mrf.mxu1 }
 0x261   : > { %v1244_v22 = vpop.f32.mrf.mxu0 }
 0x262   : > { %v3557_v49 = vpop.f32.mrf.mxu1 }
 0x264   : > { %v1357_v50 = vpop.f32.mrf.mxu1 }
 0x266   : > { %v3560_v52 = vpop.f32.mrf.mxu1 }
 0x268   : > { %v1370_v53 = vpop.f32.mrf.mxu1 }
 0x26a   : > { %v3561_v59 = vpop.f32.mrf.mxu1 }
 0x26c   : > { %v1373_v63 = vpop.f32.mrf.mxu1 }
 0x26e   : > { %v3564_v1 = vpop.f32.mrf.mxu1 }
 0x26f   : > { %v1395_v29 = vadd.f32 %v3564_v1, %v3532_v48  ;;  %v1374_v48 = vadd.f32 %v1373_v63, %v1212_v45  ;;  %v1355_v63 = vadd.f32 %v4937_v47, %v4931_v39  ;;  %v3941_v39 = vld [vmem:[#allocation4 + $0x28] sm:$0xff]   ;;  %v3942_v47 = vld [vmem:[#allocation4 + $0x30] sm:$0xff]  }
 0x270   : > { %v1386_v4 = vpop.f32.mrf.mxu1 }
 0x271   : > { %v1427_v36 = vmax.f32 %v1395_v29, 0.0  ;;  %v1387_v38 = vadd.f32 %v1386_v4, %v1225_v51  ;;  %v3943_v4 = vld [vmem:[#allocation4 + $0x38] sm:$0xff]  }
 0x272   : > { %v3565_v6 = vpop.f32.mrf.mxu1 }
 0x273   : > { %v1398_v24 = vadd.f32 %v3565_v6, %v3533_v57  ;;  %v1379_v57 = vadd.f32 %v3560_v52, %v3528_v42  ;;  %v1425_v6 = vmax.f32 %v1387_v38, 0.0  ;;  %v1358_v42 = vadd.f32 %v1357_v50, %v4935_v41  ;;  %v3939_v41 = vld [vmem:[#allocation4 + $0x18] sm:$0xff]   ;;  %v3940_v50 = vld [vmem:[#allocation4 + $0x20] sm:$0xff]  }
 0x274   : > { %v1389_v9 = vpop.f32.mrf.mxu1 }
 0x275   : > { %v1428_v33 = vmax.f32 %v1398_v24, 0.0  ;;  %v1390_v34 = vadd.f32 %v1389_v9, %v1228_v0  ;;  %v1366_v0 = vadd.f32 %v3557_v49, %v4933_v40  ;;  %v1417_v40 = vmax.f32 %v1355_v63, 0.0  ;;  %v3953_v24 = vld [vmem:[%s4652_s30 + $0x30] sm:$0xff]  }
 0x276   : > { %v3568_v12 = vpop.f32.mrf.mxu1 }
 0x277   : > { %v1411_v15 = vadd.f32 %v3568_v12, %v3536_v3  ;;  %v1382_v3 = vadd.f32 %v3561_v59, %v3529_v44  ;;  %v1426_v12 = vmax.f32 %v1390_v34, 0.0  ;;  %v1363_v44 = vadd.f32 %v3556_v46, %v4928_v37  ;;  %v3937_v37 = vld [vmem:[#allocation4 + $0x8] sm:$0xff]   ;;  %v3938_v46 = vld [vmem:[#allocation4 + $0x10] sm:$0xff]  }
 0x278   : > { %v1402_v14 = vpop.f32.mrf.mxu1  ;;  %v1420_v59 = vmax.f32 %v1366_v0, 0.0 }
 0x279   : > { %v1403_v2 = vadd.f32 %v1402_v14, %v1241_v7  ;;  %v1431_v26 = vmax.f32 %v1411_v15, 0.0  ;;  %v1438_v7 = vpack.c.bf16 %v1428_v33, %v1427_v36  ;;  %v1437_v1 = vpack.c.bf16 %v1426_v12, %v1425_v6 }
 0x27a   : > { %v3569_v20 = vpop.f32.mrf.mxu1  ;;  %v1423_v14 = vmax.f32 %v1379_v57, 0.0  ;;  %v1371_v15 = vadd.f32 %v1370_v53, %v1209_v43  ;;  %v1419_v45 = vmax.f32 %v1363_v44, 0.0  ;;  %v1418_v53 = vmax.f32 %v1358_v42, 0.0 }
 0x27b   : > { %v1414_v21 = vadd.f32 %v3569_v20, %v3537_v13  ;;  %v1429_v30 = vmax.f32 %v1403_v2, 0.0  ;;  %v1424_v13 = vmax.f32 %v1382_v3, 0.0  ;;  %v1422_v20 = vmax.f32 %v1374_v48, 0.0  ;;  %v3949_v2 = vld [vmem:[%s4646_s21 + $0x10] sm:$0xff]  }
 0x27c   : > { %v1405_v23 = vpop.f32.mrf.mxu1  ;;  %v1421_v51 = vmax.f32 %v1371_v15, 0.0  ;;  %v1434_v43 = vpack.c.bf16 %v1420_v59, %v1419_v45  ;;  %v1433_v49 = vpack.c.bf16 %v1418_v53, %v1417_v40  ;;  %3612 = vmatprep.subr.bf16.mxu1 %v3949_v2 }
 0x27d   : > { %v1432_v27 = vmax.f32 %v1414_v21, 0.0  ;;  %v1406_v28 = vadd.f32 %v1405_v23, %v1244_v22  ;;  %v1436_v9 = vpack.c.bf16 %v1424_v13, %v1423_v14  ;;  %3613 = vmatpush3.bf16.msra.mxu1 %v3949_v2  ;;  %v3950_v21 = vld [vmem:[%s4646_s21 + $0x8] sm:$0xff]   ;;  %v3951_v22 = vld [vmem:[%s4646_s21] sm:$0xff]   ;;  %v3952_v23 = vld [vmem:[%s4652_s30 + $0x38] sm:$0xff]   ;;  %s1603_s21 = sadd.f32 1.0, %s1602_s24 }
 0x27e   : > { %v1435_v52 = vpack.c.bf16 %v1422_v20, %v1421_v51  ;;  %3614 = vmatprep.subr.bf16.mxu1 %v3950_v21 }
 0x27f   : > { %v1440_v31 = vpack.c.bf16 %v1432_v27, %v1431_v26  ;;  %v1430_v32 = vmax.f32 %v1406_v28, 0.0  ;;  %v3954_v26 = vld [vmem:[%s4652_s30 + $0x28] sm:$0xff]   ;;  %v3955_v27 = vld [vmem:[%s4652_s30 + $0x20] sm:$0xff]   ;;  %v3956_v28 = vld [vmem:[%s4652_s30 + $0x18] sm:$0xff]  }
 0x281   : > { %v1439_v35 = vpack.c.bf16 %v1430_v32, %v1429_v30  ;;  %3570 = vmatprep.subr.bf16.mxu0 %v1440_v31  ;;  %3615 = vmatpush3.bf16.msra.mxu1 %v3950_v21  ;;  %v1604_v30 = vstv %s1603_s21 }
 0x282   : > { %3571 = vmatpush3.bf16.msra.mxu0 %v1440_v31  ;;  %3616 = vmatprep.subr.bf16.mxu1 %v3951_v22  ;;  %v1608_v32 = vmul.f32 %v1604_v30, %v4901_v17  ;;  %v1605_v33 = vmul.f32 %v1604_v30, %v4904_v18  ;;  %v1606_v34 = vmul.f32 %v1604_v30, %v4906_v19 }
 0x283   : > { %3572 = vmatprep.subr.bf16.mxu0 %v1439_v35  ;;  %v1612_v14 = vmul.f32 %v1604_v30, %v4877_v8  ;;  %v1609_v17 = vmul.f32 %v1604_v30, %v4883_v10  ;;  %v1610_v18 = vmul.f32 %v1604_v30, %v4885_v11  ;;  %v1611_v19 = vmul.f32 %v1604_v30, %v4873_v5 }
 0x284   : > { %v1616_v8 = vmul.f32 %v1604_v30, %v4856_v25  ;;  %v1613_v10 = vmul.f32 %v1604_v30, %v4858_v61  ;;  %v1614_v11 = vmul.f32 %v1604_v30, %v4860_v62  ;;  %v1615_v5 = vmul.f32 %v1604_v30, %v4854_v60 }
 0x285   : > { %3617 = vmatpush3.bf16.msra.mxu1 %v3951_v22  ;;  %v1620_v25 = vmul.f32 %v1604_v30, %v4844_v55  ;;  %v1617_v61 = vmul.f32 %v1604_v30, %v4846_v56  ;;  %v1618_v62 = vmul.f32 %v1604_v30, %v4850_v58  ;;  %v1619_v60 = vmul.f32 %v1604_v30, %v4842_v54  ;;  %v3957_v56 = vld [vmem:[%s4652_s30 + $0x10] sm:$0xff]   ;;  %v3958_v58 = vld [vmem:[%s4652_s30 + $0x8] sm:$0xff]   ;;  %v3959_v54 = vld [vmem:[%s4652_s30] sm:$0xff]  }
 0x286   : > { %3573 = vmatpush3.bf16.msra.mxu0 %v1439_v35  ;;  %v1607_v35 = vmul.f32 %v1604_v30, %v4898_v16 }
 0x287   : > { %3574 = vmatprep.subr.bf16.mxu0 %v1438_v7 }
 0x28a   : > { %3575 = vmatpush3.bf16.msra.mxu0 %v1438_v7 }
 0x28b   : > { %3576 = vmatprep.subr.bf16.mxu0 %v1437_v1 }
 0x28e   : > { %3577 = vmatpush3.bf16.msra.mxu0 %v1437_v1 }
 0x28f   : > { %3578 = vmatprep.subr.bf16.mxu0 %v1436_v9 }
 0x292   : > { %3579 = vmatpush3.bf16.msra.mxu0 %v1436_v9 }
 0x293   : > { %3580 = vmatprep.subr.bf16.mxu0 %v1435_v52 }
 0x296   : > { %3581 = vmatpush3.bf16.msra.mxu0 %v1435_v52 }
 0x297   : > { %3582 = vmatprep.subr.bf16.mxu0 %v1434_v43 }
 0x29a   : > { %3583 = vmatpush3.bf16.msra.mxu0 %v1434_v43 }
 0x29b   : > { %3584 = vmatprep.subr.bf16.mxu0 %v1433_v49 }
 0x29e   : > { %3585 = vmatpush3.bf16.msra.mxu0 %v1433_v49 }
 0x29f   : > { %3634 = vmatprep.subr.bf16.mxu0 %v3952_v23 }
 0x2a1   : > { %3587 = vmatmul.mubr.bf16.vlgmr.msra.gmra.mxu0 %v3937_v37 }
 0x2a2   : > { %3590 = vmatprep.mubr.bf16.mxu0 %v3938_v46  ;;  %3635 = vmatpush3.bf16.msra.mxu0 %v3952_v23 }
 0x2a3   : > { %3636 = vmatprep.subr.bf16.mxu0 %v3953_v24 }
 0x2a6   : > { %3637 = vmatpush3.bf16.msra.mxu0 %v3953_v24 }
 0x2a7   : > { %3638 = vmatprep.subr.bf16.mxu0 %v3954_v26 }
 0x2a9   : > { %3591 = vmatmul.mubr.bf16.gmra.mxu0 %v3939_v41 }
 0x2aa   : > { %3594 = vmatprep.mubr.bf16.mxu0 %v3940_v50  ;;  %3639 = vmatpush3.bf16.msra.mxu0 %v3954_v26 }
 0x2ab   : > { %3640 = vmatprep.subr.bf16.mxu0 %v3955_v27 }
 0x2ae   : > { %3641 = vmatpush3.bf16.msra.mxu0 %v3955_v27  ;;  %v3225_v27 = vld [vmem:[%s4675_s9] ss:$0 sm:$0xff] }
 0x2af   : > { %3642 = vmatprep.subr.bf16.mxu0 %v3956_v28 }
 0x2b1   : > { %3595 = vmatmul.mubr.bf16.gmra.mxu0 %v3941_v39 }
 0x2b2   : > { %3598 = vmatprep.mubr.bf16.mxu0 %v3942_v47  ;;  %3643 = vmatpush3.bf16.msra.mxu0 %v3956_v28 }
 0x2b3   : > { %3644 = vmatprep.subr.bf16.mxu0 %v3957_v56 }
 0x2b6   : > { %3645 = vmatpush3.bf16.msra.mxu0 %v3957_v56 }
 0x2b7   : > { %3646 = vmatprep.subr.bf16.mxu0 %v3958_v58 }
 0x2b9   : > { %3599 = vmatmul.mubr.bf16.gmra.mxu0 %v3943_v4 }
 0x2ba   : > { %3647 = vmatpush3.bf16.msra.mxu0 %v3958_v58 }
 0x2bb   : > { %3648 = vmatprep.subr.bf16.mxu0 %v3959_v54 }
 0x2be   : > { %3649 = vmatpush3.bf16.msra.mxu0 %v3959_v54 }
 0x361   : > { %v3588_v29 = vpop.f32.mrf.mxu0 }
 0x362   : > { %v1623_v57 = vadd.f32 %v3588_v29, %v1607_v35 }
 0x363   : > { %v1539_v31 = vpop.f32.mrf.mxu0 }
 0x364   : > { %v1621_v7 = vadd.f32 %v1605_v33, %v1539_v31 }
 0x365   : > { %v3589_v36 = vpop.f32.mrf.mxu0 }
 0x366   : > { %v1624_v38 = vadd.f32 %v3589_v36, %v1608_v32 }
 0x367   : > { %v1542_v3 = vpop.f32.mrf.mxu0 }
 0x368   : > { %v1622_v12 = vadd.f32 %v1606_v34, %v1542_v3  ;;  %v1638_v48 = vpack.c.bf16 %v1624_v38, %v1623_v57 }
 0x369   : > { %v3592_v6 = vpop.f32.mrf.mxu0 }
 0x36a   : > { %v1637_v13 = vpack.c.bf16 %v1622_v12, %v1621_v7  ;;  %v1627_v44 = vadd.f32 %v3592_v6, %v1611_v19 }
 0x36b   : > { %v1555_v1 = vpop.f32.mrf.mxu0 }
 0x36c   : > { %3618 = vmatprep.mubr.bf16.mxu1 %v1637_v13  ;;  %v1625_v9 = vadd.f32 %v1609_v17, %v1555_v1 }
 0x36d   : > { %v3593_v16 = vpop.f32.mrf.mxu0  ;;  %3619 = vmatmul.mubr.bf16.vlgmr.msra.gmra.mxu1 %v1638_v48 }
 0x36e   : > { %v1628_v15 = vadd.f32 %v3593_v16, %v1612_v14 }
 0x36f   : > { %v1558_v0 = vpop.f32.mrf.mxu0 }
 0x370   : > { %v1626_v20 = vadd.f32 %v1610_v18, %v1558_v0  ;;  %v1640_v42 = vpack.c.bf16 %v1628_v15, %v1627_v44 }
 0x371   : > { %v3596_v51 = vpop.f32.mrf.mxu0 }
 0x372   : > { %v1639_v59 = vpack.c.bf16 %v1626_v20, %v1625_v9  ;;  %v1631_v49 = vadd.f32 %v3596_v51, %v1615_v5 }
 0x373   : > { %v1571_v52 = vpop.f32.mrf.mxu0 }
 0x374   : > { %3622 = vmatprep.mubr.bf16.mxu1 %v1639_v59  ;;  %v1629_v53 = vadd.f32 %v1613_v10, %v1571_v52 }
 0x375   : > { %v3597_v45 = vpop.f32.mrf.mxu0  ;;  %3623 = vmatmul.mubr.bf16.gmra.mxu1 %v1640_v42 }
 0x376   : > { %v1632_v63 = vadd.f32 %v3597_v45, %v1616_v8 }
 0x377   : > { %v1574_v43 = vpop.f32.mrf.mxu0 }
 0x378   : > { %v1630_v40 = vadd.f32 %v1614_v11, %v1574_v43  ;;  %v1642_v41 = vpack.c.bf16 %v1632_v63, %v1631_v49 }
 0x379   : > { %v3600_v37 = vpop.f32.mrf.mxu0 }
 0x37a   : > { %v1641_v46 = vpack.c.bf16 %v1630_v40, %v1629_v53  ;;  %v1635_v22 = vadd.f32 %v3600_v37, %v1619_v60 }
 0x37b   : > { %v1587_v50 = vpop.f32.mrf.mxu0 }
 0x37c   : > { %3626 = vmatprep.mubr.bf16.mxu1 %v1641_v46  ;;  %v1633_v2 = vadd.f32 %v1617_v61, %v1587_v50 }
 0x37d   : > { %v3601_v39 = vpop.f32.mrf.mxu0  ;;  %3627 = vmatmul.mubr.bf16.gmra.mxu1 %v1642_v41 }
 0x37e   : > { %v1636_v47 = vadd.f32 %v3601_v39, %v1620_v25 }
 0x37f   : > { %v1590_v4 = vpop.f32.mrf.mxu0 }
 0x380   : > { %v1634_v21 = vadd.f32 %v1618_v62, %v1590_v4  ;;  %v1644_v55 = vpack.c.bf16 %v1636_v47, %v1635_v22 }
 0x382   : > { %v1643_v23 = vpack.c.bf16 %v1634_v21, %v1633_v2  ;;  %v3234_v21 = vld [vmem:[%s4675_s9 + $0x1] ss:$0 sm:$0xff] }
 0x384   : > { %3630 = vmatprep.mubr.bf16.mxu1 %v1643_v23 }
 0x385   : > { %3631 = vmatmul.mubr.bf16.gmra.mxu1 %v1644_v55 }
 0x42d   : > { %v3620_v24 = vpop.f32.mrf.mxu1 }
 0x42e   : > { %v1757_v31 = vadd.f32 %v3620_v24, %v3225_v27 }
 0x42f   : > { %v1748_v26 = vpop.f32.mrf.mxu1 }
 0x430   : > { %v1749_v29 = vadd.f32 %v3225_v27, %v1748_v26  ;;  %v1813_v3 = vmax.f32 %v1757_v31, 0.0 }
 0x431   : > { %v3621_v28 = vpop.f32.mrf.mxu1 }
 0x432   : > { %v1760_v30 = vadd.f32 %v3621_v28, %v3225_v27  ;;  %v1811_v36 = vmax.f32 %v1749_v29, 0.0 }
 0x433   : > { %v1751_v32 = vpop.f32.mrf.mxu1 }
 0x434   : > { %v1752_v33 = vadd.f32 %v3225_v27, %v1751_v32  ;;  %v1814_v34 = vmax.f32 %v1760_v30, 0.0 }
 0x435   : > { %v3624_v35 = vpop.f32.mrf.mxu1 }
 0x436   : > { %v1812_v38 = vmax.f32 %v1752_v33, 0.0  ;;  %v1828_v57 = vpack.c.bf16 %v1814_v34, %v1813_v3  ;;  %v1773_v1 = vadd.f32 %v3624_v35, %v3225_v27 }
 0x437   : > { %v1764_v7 = vpop.f32.mrf.mxu1 }
 0x438   : > { %v1827_v12 = vpack.c.bf16 %v1812_v38, %v1811_v36  ;;  %v1765_v13 = vadd.f32 %v3225_v27, %v1764_v7  ;;  %v1817_v0 = vmax.f32 %v1773_v1, 0.0 }
 0x439   : > { %v3625_v6 = vpop.f32.mrf.mxu1 }
 0x43a   : > { %v1776_v48 = vadd.f32 %v3625_v6, %v3225_v27  ;;  %3650 = vmatprep.mubr.bf16.mxu0 %v1827_v12  ;;  %v1815_v16 = vmax.f32 %v1765_v13, 0.0 }
 0x43b   : > { %v1767_v14 = vpop.f32.mrf.mxu1  ;;  %3651 = vmatmul.mubr.bf16.vlgmr.msra.gmra.mxu0 %v1828_v57 }
 0x43c   : > { %v1768_v17 = vadd.f32 %v3225_v27, %v1767_v14  ;;  %v1818_v18 = vmax.f32 %v1776_v48, 0.0 }
 0x43d   : > { %v3628_v19 = vpop.f32.mrf.mxu1 }
 0x43e   : > { %v1816_v15 = vmax.f32 %v1768_v17, 0.0  ;;  %v1830_v44 = vpack.c.bf16 %v1818_v18, %v1817_v0  ;;  %v1789_v52 = vadd.f32 %v3628_v19, %v3225_v27 }
 0x43f   : > { %v1780_v9 = vpop.f32.mrf.mxu1 }
 0x440   : > { %v1829_v20 = vpack.c.bf16 %v1816_v15, %v1815_v16  ;;  %v1781_v59 = vadd.f32 %v3225_v27, %v1780_v9  ;;  %v1821_v43 = vmax.f32 %v1789_v52, 0.0 }
 0x441   : > { %v3629_v51 = vpop.f32.mrf.mxu1 }
 0x442   : > { %v1792_v42 = vadd.f32 %v3629_v51, %v3225_v27  ;;  %3654 = vmatprep.mubr.bf16.mxu0 %v1829_v20  ;;  %v1819_v45 = vmax.f32 %v1781_v59, 0.0 }
 0x443   : > { %v1783_v8 = vpop.f32.mrf.mxu1  ;;  %3655 = vmatmul.mubr.bf16.gmra.mxu0 %v1830_v44 }
 0x444   : > { %v1784_v10 = vadd.f32 %v3225_v27, %v1783_v8  ;;  %v1822_v11 = vmax.f32 %v1792_v42, 0.0 }
 0x445   : > { %v3632_v5 = vpop.f32.mrf.mxu1 }
 0x446   : > { %v1820_v63 = vmax.f32 %v1784_v10, 0.0  ;;  %v1832_v49 = vpack.c.bf16 %v1822_v11, %v1821_v43  ;;  %v1805_v50 = vadd.f32 %v3632_v5, %v3225_v27 }
 0x447   : > { %v1796_v53 = vpop.f32.mrf.mxu1 }
 0x448   : > { %v1831_v40 = vpack.c.bf16 %v1820_v63, %v1819_v45  ;;  %v1797_v46 = vadd.f32 %v3225_v27, %v1796_v53  ;;  %v1825_v47 = vmax.f32 %v1805_v50, 0.0 }
 0x449   : > { %v3633_v37 = vpop.f32.mrf.mxu1 }
 0x44a   : > { %v1808_v41 = vadd.f32 %v3633_v37, %v3225_v27  ;;  %3658 = vmatprep.mubr.bf16.mxu0 %v1831_v40  ;;  %v1823_v60 = vmax.f32 %v1797_v46, 0.0 }
 0x44b   : > { %v1799_v25 = vpop.f32.mrf.mxu1  ;;  %3659 = vmatmul.mubr.bf16.gmra.mxu0 %v1832_v49 }
 0x44c   : > { %v1800_v61 = vadd.f32 %v3225_v27, %v1799_v25  ;;  %v1826_v62 = vmax.f32 %v1808_v41, 0.0 }
 0x44e   : > { %v1824_v39 = vmax.f32 %v1800_v61, 0.0  ;;  %v1834_v2 = vpack.c.bf16 %v1826_v62, %v1825_v47 }
 0x450   : > { %v1833_v4 = vpack.c.bf16 %v1824_v39, %v1823_v60 }
 0x452   : > { %3662 = vmatprep.mubr.bf16.mxu0 %v1833_v4 }
 0x453   : > { %3663 = vmatmul.mubr.bf16.gmra.mxu0 %v1834_v2 }
 0x4fb   : > { %v3652_v22 = vpop.f32.mrf.mxu0 }
 0x4fc   : > { %v4974_v23 = vadd.f32 %v3652_v22, %v3234_v21 }
 0x4fd   : > { %v1938_v55 = vpop.f32.mrf.mxu0 }
 0x4fe   : > { %v4976_v56 = vadd.f32 %v3234_v21, %v1938_v55 }
 0x4ff   : > { %v3653_v58 = vpop.f32.mrf.mxu0 }
 0x500   : > { %v4978_v54 = vadd.f32 %v3653_v58, %v3234_v21 }
 0x501   : > { %v1941_v24 = vpop.f32.mrf.mxu0 }
 0x502   : > { %v4980_v26 = vadd.f32 %v3234_v21, %v1941_v24 }
 0x503   : > { %v3656_v27 = vpop.f32.mrf.mxu0 }
 0x504   : > { %v4982_v28 = vadd.f32 %v3656_v27, %v3234_v21 }
 0x505   : > { %v1954_v29 = vpop.f32.mrf.mxu0 }
 0x506   : > { %v4984_v30 = vadd.f32 %v3234_v21, %v1954_v29 }
 0x507   : > { %v3657_v31 = vpop.f32.mrf.mxu0 }
 0x508   : > { %v4986_v32 = vadd.f32 %v3657_v31, %v3234_v21 }
 0x509   : > { %v1957_v33 = vpop.f32.mrf.mxu0 }
 0x50a   : > { %v4988_v34 = vadd.f32 %v3234_v21, %v1957_v33 }
 0x50b   : > { %v3660_v35 = vpop.f32.mrf.mxu0 }
 0x50c   : > { %v4990_v36 = vadd.f32 %v3660_v35, %v3234_v21 }
 0x50d   : > { %v1970_v38 = vpop.f32.mrf.mxu0 }
 0x50e   : > { %v4992_v3 = vadd.f32 %v3234_v21, %v1970_v38 }
 0x50f   : > { %v3661_v7 = vpop.f32.mrf.mxu0 }
 0x510   : > { %v4994_v12 = vadd.f32 %v3661_v7, %v3234_v21 }
 0x511   : > { %v1973_v57 = vpop.f32.mrf.mxu0 }
 0x512   : > { %v4996_v6 = vadd.f32 %v3234_v21, %v1973_v57 }
 0x513   : > { %v3664_v13 = vpop.f32.mrf.mxu0 }
 0x514   : > { %v4998_v48 = vadd.f32 %v3664_v13, %v3234_v21 }
 0x515   : > { %v1986_v1 = vpop.f32.mrf.mxu0 }
 0x516   : > { %v5000_v14 = vadd.f32 %v3234_v21, %v1986_v1  ;;  %2004 = sbr.rel (%p3243_p13) target bundleno = 1317 (0x525), region = 128 }
 0x517   : > { %v3665_v17 = vpop.f32.mrf.mxu0 }
 0x518   : > { %v5002_v18 = vadd.f32 %v3665_v17, %v3234_v21 }
 0x519   : > { %v1989_v19 = vpop.f32.mrf.mxu0 }
 0x51a   : > { %v5004_v16 = vadd.f32 %v3234_v21, %v1989_v19 }
 0x51b   : > { %v2005_v15 = vmax.f32 %v4976_v56, 0.0  ;;  %v2006_v0 = vmax.f32 %v4980_v26, 0.0  ;;  %v2007_v9 = vmax.f32 %v4974_v23, 0.0  ;;  %v2008_v20 = vmax.f32 %v4978_v54, 0.0 }
 0x51c   : > { %v2009_v44 = vmax.f32 %v4984_v30, 0.0  ;;  %v2010_v51 = vmax.f32 %v4988_v34, 0.0  ;;  %v2011_v59 = vmax.f32 %v4982_v28, 0.0  ;;  %v2012_v42 = vmax.f32 %v4986_v32, 0.0 }
 0x51d   : > { %2021 = vst [vmem:[#allocation2 + $0x30] sm:$0xff] %v2005_v15  ;;  %2022 = vst [vmem:[#allocation2] sm:$0xff] %v2006_v0  ;;  %v2013_v52 = vmax.f32 %v4992_v3, 0.0  ;;  %v2014_v8 = vmax.f32 %v4996_v6, 0.0  ;;  %v2015_v10 = vmax.f32 %v4990_v36, 0.0  ;;  %v2016_v11 = vmax.f32 %v4994_v12, 0.0 }
 0x51e   : > { %2023 = vst [vmem:[#allocation2 + $0x58] sm:$0xff] %v2007_v9  ;;  %2024 = vst [vmem:[#allocation2 + $0x18] sm:$0xff] %v2008_v20  ;;  %v2017_v5 = vmax.f32 %v5000_v14, 0.0  ;;  %v2018_v45 = vmax.f32 %v5004_v16, 0.0  ;;  %v2019_v63 = vmax.f32 %v4998_v48, 0.0  ;;  %v2020_v43 = vmax.f32 %v5002_v18, 0.0 }
 0x51f   : > { %2025 = vst [vmem:[#allocation2 + $0x50] sm:$0xff] %v2009_v44  ;;  %2026 = vst [vmem:[#allocation2 + $0x68] sm:$0xff] %v2010_v51 }
 0x520   : > { %2027 = vst [vmem:[#allocation2 + $0x8] sm:$0xff] %v2011_v59  ;;  %2028 = vst [vmem:[#allocation2 + $0x48] sm:$0xff] %v2012_v42 }
 0x521   : > { %2029 = vst [vmem:[#allocation2 + $0x40] sm:$0xff] %v2013_v52  ;;  %2030 = vst [vmem:[#allocation2 + $0x20] sm:$0xff] %v2014_v8 }
 0x522   : > { %2031 = vst [vmem:[#allocation2 + $0x10] sm:$0xff] %v2015_v10  ;;  %2032 = vst [vmem:[#allocation2 + $0x38] sm:$0xff] %v2016_v11 }
 0x523   : > { %2033 = vst [vmem:[#allocation2 + $0x60] sm:$0xff] %v2017_v5  ;;  %2034 = vst [vmem:[#allocation2 + $0x70] sm:$0xff] %v2018_v45 }
 0x524   : > { %2035 = vst [vmem:[#allocation2 + $0x78] sm:$0xff] %v2019_v63  ;;  %2036 = vst [vmem:[#allocation2 + $0x28] sm:$0xff] %v2020_v43 }
 0x525 PF: > { %p3244_p7 = scmp.ne.s32.totalorder %s4420_s27, 5 }
 0x526   : > { %s5290_s16 = sld [smem:[#allocation38_spill]] (!%p3244_p7) }
 0x527   : > { %2040 = sbr.rel (%p3244_p7) target bundleno = 2213 (0x8a5), region = 132  ;;  %s5291_s30 = sld [smem:[#allocation41_spill]] (!%p3244_p7) }
 0x528   : > { %s2215_s9 = sld [smem:[#allocation20]] (!%p3244_p7) }
 0x529   : > { %s3263_s20 = sld [smem:[#allocation20 + $0x1]] (!%p3244_p7) }
 0x52a   : > { %s3273_s14 = sld [smem:[#allocation20 + $0x2]] (!%p3244_p7) }
 0x52b   : > { %s5292_s29 = sld [smem:[#allocation42_spill]] (!%p3244_p7) }
 0x52c   : > { %v3960_v53 = vld [vmem:[%s5290_s16 + $0x38] sm:$0xff]   ;;  %v2041_v40 = vpack.c.bf16 %v4980_v26, %v4976_v56  ;;  %v3961_v49 = vld [vmem:[%s5290_s16 + $0x30] sm:$0xff]   ;;  %v3962_v37 = vld [vmem:[%s5290_s16 + $0x28] sm:$0xff]   ;;  %v2042_v4 = vpack.c.bf16 %v4978_v54, %v4974_v23  ;;  %v2043_v2 = vpack.c.bf16 %v4988_v34, %v4984_v30  ;;  %v2044_v21 = vpack.c.bf16 %v4986_v32, %v4982_v28 }
 0x52d   : > { %3666 = vmatprep.subr.bf16.mxu0 %v3960_v53  ;;  %v3963_v46 = vld [vmem:[%s5290_s16 + $0x20] sm:$0xff]   ;;  %v3964_v25 = vld [vmem:[%s5290_s16 + $0x18] sm:$0xff]   ;;  %v3965_v62 = vld [vmem:[%s5290_s16 + $0x10] sm:$0xff]   ;;  %v2045_v22 = vpack.c.bf16 %v4996_v6, %v4992_v3  ;;  %v2046_v55 = vpack.c.bf16 %v4994_v12, %v4990_v36  ;;  %v2047_v23 = vpack.c.bf16 %v5004_v16, %v5000_v14  ;;  %v2048_v56 = vpack.c.bf16 %v5002_v18, %v4998_v48 }
 0x52e   : > { %3682 = vmatprep.mubr.bf16.mxu0 %v2041_v40  ;;  %3667 = vmatpush3.bf16.msra.mxu0 %v3960_v53  ;;  %v3968_v41 = vld [vmem:[#allocation16 + $0x38] sm:$0xff]   ;;  %v3969_v50 = vld [vmem:[#allocation16 + $0x30] sm:$0xff]   ;;  %v3970_v61 = vld [vmem:[#allocation16 + $0x28] sm:$0xff]   ;;  %v5075_v13 = vstv %s2215_s9 }
 0x52f   : > { %3668 = vmatprep.subr.bf16.mxu0 %v3961_v49  ;;  %3698 = vmatprep.subr.bf16.mxu1 %v3968_v41  ;;  %v3971_v60 = vld [vmem:[#allocation16 + $0x20] sm:$0xff]   ;;  %v3967_v47 = vld [vmem:[%s5290_s16] sm:$0xff]   ;;  %v3974_v24 = vld [vmem:[#allocation16 + $0x8] sm:$0xff]  }
 0x530   : > { %3699 = vmatpush3.bf16.msra.mxu1 %v3968_v41  ;;  %v3966_v39 = vld [vmem:[%s5290_s16 + $0x8] sm:$0xff]   ;;  %v3973_v54 = vld [vmem:[#allocation16 + $0x10] sm:$0xff]   ;;  %v3978_v29 = vld [vmem:[#allocation17 + $0x28] sm:$0xff]  }
 0x531   : > { %3700 = vmatprep.subr.bf16.mxu1 %v3969_v50  ;;  %v3972_v58 = vld [vmem:[#allocation16 + $0x18] sm:$0xff]   ;;  %v3975_v26 = vld [vmem:[#allocation16] sm:$0xff]   ;;  %v3977_v28 = vld [vmem:[#allocation17 + $0x30] sm:$0xff]  }
 0x532   : > { %3669 = vmatpush3.bf16.msra.mxu0 %v3961_v49  ;;  %v3976_v27 = vld [vmem:[#allocation17 + $0x38] sm:$0xff]   ;;  %v3979_v30 = vld [vmem:[#allocation17 + $0x20] sm:$0xff]   ;;  %v5069_v32 = vld [vmem:[%s5291_s30] ss:$0 sm:$0xff] }
 0x533   : > { %3670 = vmatprep.subr.bf16.mxu0 %v3962_v37 }
 0x534   : > { %3701 = vmatpush3.bf16.msra.mxu1 %v3969_v50 }
 0x535   : > { %3702 = vmatprep.subr.bf16.mxu1 %v3970_v61 }
 0x536   : > { %3671 = vmatpush3.bf16.msra.mxu0 %v3962_v37 }
 0x537   : > { %3672 = vmatprep.subr.bf16.mxu0 %v3963_v46 }
 0x538   : > { %3703 = vmatpush3.bf16.msra.mxu1 %v3970_v61 }
 0x539   : > { %3704 = vmatprep.subr.bf16.mxu1 %v3971_v60 }
 0x53a   : > { %3673 = vmatpush3.bf16.msra.mxu0 %v3963_v46 }
 0x53b   : > { %3674 = vmatprep.subr.bf16.mxu0 %v3964_v25 }
 0x53c   : > { %3705 = vmatpush3.bf16.msra.mxu1 %v3971_v60 }
 0x53d   : > { %3706 = vmatprep.subr.bf16.mxu1 %v3972_v58 }
 0x53e   : > { %3675 = vmatpush3.bf16.msra.mxu0 %v3964_v25 }
 0x53f   : > { %3676 = vmatprep.subr.bf16.mxu0 %v3965_v62 }
 0x540   : > { %3707 = vmatpush3.bf16.msra.mxu1 %v3972_v58 }
 0x541   : > { %3708 = vmatprep.subr.bf16.mxu1 %v3973_v54 }
 0x542   : > { %3677 = vmatpush3.bf16.msra.mxu0 %v3965_v62 }
 0x543   : > { %3678 = vmatprep.subr.bf16.mxu0 %v3966_v39 }
 0x544   : > { %3709 = vmatpush3.bf16.msra.mxu1 %v3973_v54 }
 0x545   : > { %3710 = vmatprep.subr.bf16.mxu1 %v3974_v24 }
 0x546   : > { %3679 = vmatpush3.bf16.msra.mxu0 %v3966_v39 }
 0x547   : > { %3680 = vmatprep.subr.bf16.mxu0 %v3967_v47 }
 0x548   : > { %3711 = vmatpush3.bf16.msra.mxu1 %v3974_v24 }
 0x549   : > { %3712 = vmatprep.subr.bf16.mxu1 %v3975_v26 }
 0x54a   : > { %3681 = vmatpush3.bf16.msra.mxu0 %v3967_v47 }
 0x54b   : > { %3730 = vmatprep.subr.bf16.mxu0 %v3976_v27 }
 0x54c   : > { %3713 = vmatpush3.bf16.msra.mxu1 %v3975_v26 }
 0x54d   : > { %3683 = vmatmul.mubr.bf16.vlgmr.msra.gmra.mxu0 %v2042_v4 }
 0x54e   : > { %3686 = vmatprep.mubr.bf16.mxu0 %v2043_v2  ;;  %3731 = vmatpush3.bf16.msra.mxu0 %v3976_v27 }
 0x54f   : > { %3732 = vmatprep.subr.bf16.mxu0 %v3977_v28 }
 0x552   : > { %3733 = vmatpush3.bf16.msra.mxu0 %v3977_v28 }
 0x553   : > { %3734 = vmatprep.subr.bf16.mxu0 %v3978_v29 }
 0x555   : > { %3687 = vmatmul.mubr.bf16.gmra.mxu0 %v2044_v21 }
 0x556   : > { %3690 = vmatprep.mubr.bf16.mxu0 %v2045_v22  ;;  %3735 = vmatpush3.bf16.msra.mxu0 %v3978_v29 }
 0x557   : > { %3736 = vmatprep.subr.bf16.mxu0 %v3979_v30 }
 0x55a   : > { %3737 = vmatpush3.bf16.msra.mxu0 %v3979_v30 }
 0x55d   : > { %3691 = vmatmul.mubr.bf16.gmra.mxu0 %v2046_v55 }
 0x55e   : > { %3694 = vmatprep.mubr.bf16.mxu0 %v2047_v23 }
 0x565   : > { %3695 = vmatmul.mubr.bf16.gmra.mxu0 %v2048_v56 }
 0x60d   : > { %v3684_v31 = vpop.f32.mrf.mxu0 }
 0x60e   : > { %v2161_v34 = vadd.f32 %v3684_v31, %v5069_v32 }
 0x60f   : > { %v2152_v33 = vpop.f32.mrf.mxu0 }
 0x610   : > { %v2153_v35 = vadd.f32 %v5069_v32, %v2152_v33  ;;  %v2234_v12 = vmin.f32 %v2161_v34, 0.0  ;;  %v2218_v59 = vmax.f32 %v2161_v34, 0.0 }
 0x611   : > { %v3685_v36 = vpop.f32.mrf.mxu0 }
 0x612   : > { %v2164_v38 = vadd.f32 %v3685_v36, %v5069_v32  ;;  %v2232_v3 = vmin.f32 %v2153_v35, 0.0  ;;  %v2251_v19 = vmul.f32 %v5075_v13, %v2234_v12  ;;  %v2216_v9 = vmax.f32 %v2153_v35, 0.0 }
 0x613   : > { %v2155_v7 = vpop.f32.mrf.mxu0 }
 0x614   : > { %v2235_v57 = vmin.f32 %v2164_v38, 0.0  ;;  %v2156_v6 = vadd.f32 %v5069_v32, %v2155_v7  ;;  %v2249_v18 = vmul.f32 %v5075_v13, %v2232_v3  ;;  %v2219_v16 = vmax.f32 %v2164_v38, 0.0 }
 0x615   : > { %v3688_v48 = vpop.f32.mrf.mxu0  ;;  %v2267_v45 = vadd.f32 %v2251_v19, %v2218_v59 }
 0x616   : > { %v2252_v1 = vmul.f32 %v5075_v13, %v2235_v57  ;;  %v2233_v14 = vmin.f32 %v2156_v6, 0.0  ;;  %v2177_v15 = vadd.f32 %v3688_v48, %v5069_v32  ;;  %v2217_v20 = vmax.f32 %v2156_v6, 0.0 }
 0x617   : > { %v2168_v17 = vpop.f32.mrf.mxu0  ;;  %v2265_v11 = vadd.f32 %v2249_v18, %v2216_v9 }
 0x618   : > { %v2169_v0 = vadd.f32 %v5069_v32, %v2168_v17  ;;  %v2250_v51 = vmul.f32 %v5075_v13, %v2233_v14  ;;  %v2268_v42 = vadd.f32 %v2252_v1, %v2219_v16  ;;  %v2238_v63 = vmin.f32 %v2177_v15, 0.0 }
 0x619   : > { %v3689_v44 = vpop.f32.mrf.mxu0  ;;  %v2222_v22 = vmax.f32 %v2177_v15, 0.0 }
 0x61a   : > { %v2180_v52 = vadd.f32 %v3689_v44, %v5069_v32  ;;  %v2236_v8 = vmin.f32 %v2169_v0, 0.0  ;;  %v2266_v5 = vadd.f32 %v2250_v51, %v2217_v20  ;;  %v2282_v46 = vpack.c.bf16 %v2268_v42, %v2267_v45 }
 0x61b   : > { %v2171_v10 = vpop.f32.mrf.mxu0  ;;  %v2255_v61 = vmul.f32 %v5075_v13, %v2238_v63  ;;  %v2220_v47 = vmax.f32 %v2169_v0, 0.0 }
 0x61c   : > { %v2239_v43 = vmin.f32 %v2180_v52, 0.0  ;;  %v2172_v53 = vadd.f32 %v5069_v32, %v2171_v10  ;;  %v2281_v49 = vpack.c.bf16 %v2266_v5, %v2265_v11  ;;  %v2253_v41 = vmul.f32 %v5075_v13, %v2236_v8 }
 0x61d   : > { %v3692_v40 = vpop.f32.mrf.mxu0  ;;  %v2223_v62 = vmax.f32 %v2180_v52, 0.0  ;;  %v2271_v26 = vadd.f32 %v2255_v61, %v2222_v22  ;;  %v3981_v61 = vld [vmem:[#allocation17 + $0x10] sm:$0xff]  }
 0x61e   : > { %v2256_v37 = vmul.f32 %v5075_v13, %v2239_v43  ;;  %v2237_v50 = vmin.f32 %v2172_v53, 0.0  ;;  %3714 = vmatprep.mubr.bf16.mxu1 %v2281_v49  ;;  %v2193_v60 = vadd.f32 %v3692_v40, %v5069_v32  ;;  %v2221_v4 = vmax.f32 %v2172_v53, 0.0 }
 0x61f   : > { %v2184_v25 = vpop.f32.mrf.mxu0  ;;  %3715 = vmatmul.mubr.bf16.vlgmr.msra.gmra.mxu1 %v2282_v46  ;;  %v2269_v56 = vadd.f32 %v2253_v41, %v2220_v47  ;;  %v3986_v47 = vld [vmem:[#allocation19 + $0x28] sm:$0xff]  }
 0x620   : > { %v2185_v39 = vadd.f32 %v5069_v32, %v2184_v25  ;;  %v2254_v2 = vmul.f32 %v5075_v13, %v2237_v50  ;;  %v2272_v55 = vadd.f32 %v2256_v37, %v2223_v62  ;;  %v2242_v27 = vmin.f32 %v2193_v60, 0.0  ;;  %v3980_v25 = vld [vmem:[#allocation17 + $0x18] sm:$0xff]   ;;  %v3982_v62 = vld [vmem:[#allocation17 + $0x8] sm:$0xff]  }
 0x621   : > { %v3693_v21 = vpop.f32.mrf.mxu0  ;;  %v2226_v17 = vmax.f32 %v2193_v60, 0.0  ;;  %3738 = vmatprep.subr.bf16.mxu0 %v3980_v25  ;;  %v3983_v60 = vld [vmem:[#allocation17] sm:$0xff]  }
 0x622   : > { %v2196_v23 = vadd.f32 %v3693_v21, %v5069_v32  ;;  %v2270_v58 = vadd.f32 %v2254_v2, %v2221_v4  ;;  %v2240_v54 = vmin.f32 %v2185_v39, 0.0  ;;  %v2284_v34 = vpack.c.bf16 %v2272_v55, %v2271_v26  ;;  %3739 = vmatpush3.bf16.msra.mxu0 %v3980_v25  ;;  %v3987_v4 = vld [vmem:[#allocation19 + $0x20] sm:$0xff]   ;;  %v5108_v21 = vld [vmem:[%s5291_s30 + $0x1] ss:$0 sm:$0xff] }
 0x623   : > { %v2187_v24 = vpop.f32.mrf.mxu0  ;;  %v2259_v3 = vmul.f32 %v5075_v13, %v2242_v27  ;;  %v2224_v6 = vmax.f32 %v2185_v39, 0.0  ;;  %3740 = vmatprep.subr.bf16.mxu0 %v3981_v61  ;;  %v3985_v39 = vld [vmem:[#allocation19 + $0x30] sm:$0xff]  }
 0x624   : > { %v2243_v28 = vmin.f32 %v2196_v23, 0.0  ;;  %v2188_v29 = vadd.f32 %v5069_v32, %v2187_v24  ;;  %v2283_v31 = vpack.c.bf16 %v2270_v58, %v2269_v56  ;;  %v2257_v35 = vmul.f32 %v5075_v13, %v2240_v54 }
 0x625   : > { %v3696_v30 = vpop.f32.mrf.mxu0  ;;  %v2227_v7 = vmax.f32 %v2196_v23, 0.0  ;;  %v2275_v20 = vadd.f32 %v2259_v3, %v2226_v17 }
 0x626   : > { %v2260_v33 = vmul.f32 %v5075_v13, %v2243_v28  ;;  %v2241_v36 = vmin.f32 %v2188_v29, 0.0  ;;  %3718 = vmatprep.mubr.bf16.mxu1 %v2283_v31  ;;  %v2209_v12 = vadd.f32 %v3696_v30, %v5069_v32  ;;  %v2225_v48 = vmax.f32 %v2188_v29, 0.0  ;;  %3741 = vmatpush3.bf16.msra.mxu0 %v3981_v61 }
 0x627   : > { %v2200_v38 = vpop.f32.mrf.mxu0  ;;  %3719 = vmatmul.mubr.bf16.gmra.mxu1 %v2284_v34  ;;  %v2273_v16 = vadd.f32 %v2257_v35, %v2224_v6  ;;  %3742 = vmatprep.subr.bf16.mxu0 %v3982_v62  ;;  %v5113_v28 = vstv %s3263_s20 }
 0x628   : > { %v2201_v57 = vadd.f32 %v5069_v32, %v2200_v38  ;;  %v2258_v1 = vmul.f32 %v5075_v13, %v2241_v36  ;;  %v2276_v18 = vadd.f32 %v2260_v33, %v2227_v7  ;;  %v2246_v44 = vmin.f32 %v2209_v12, 0.0 }
 0x629   : > { %v3697_v14 = vpop.f32.mrf.mxu0  ;;  %v2230_v40 = vmax.f32 %v2209_v12, 0.0 }
 0x62a   : > { %v2212_v19 = vadd.f32 %v3697_v14, %v5069_v32  ;;  %v2274_v15 = vadd.f32 %v2258_v1, %v2225_v48  ;;  %v2244_v0 = vmin.f32 %v2201_v57, 0.0  ;;  %v2286_v8 = vpack.c.bf16 %v2276_v18, %v2275_v20  ;;  %3743 = vmatpush3.bf16.msra.mxu0 %v3982_v62 }
 0x62b   : > { %v2203_v9 = vpop.f32.mrf.mxu0  ;;  %v2263_v5 = vmul.f32 %v5075_v13, %v2246_v44  ;;  %v2228_v63 = vmax.f32 %v2201_v57, 0.0  ;;  %3744 = vmatprep.subr.bf16.mxu0 %v3983_v60 }
 0x62c   : > { %v2247_v51 = vmin.f32 %v2212_v19, 0.0  ;;  %v2204_v59 = vadd.f32 %v5069_v32, %v2203_v9  ;;  %v2285_v42 = vpack.c.bf16 %v2274_v15, %v2273_v16  ;;  %v2261_v10 = vmul.f32 %v5075_v13, %v2244_v0 }
 0x62d   : > { %v2231_v45 = vmax.f32 %v2212_v19, 0.0  ;;  %v2279_v46 = vadd.f32 %v2263_v5, %v2230_v40 }
 0x62e   : > { %v2264_v52 = vmul.f32 %v5075_v13, %v2247_v51  ;;  %v2245_v11 = vmin.f32 %v2204_v59, 0.0  ;;  %3722 = vmatprep.mubr.bf16.mxu1 %v2285_v42  ;;  %v2229_v43 = vmax.f32 %v2204_v59, 0.0  ;;  %v2277_v37 = vadd.f32 %v2261_v10, %v2228_v63  ;;  %3745 = vmatpush3.bf16.msra.mxu0 %v3983_v60 }
 0x62f   : > { %3723 = vmatmul.mubr.bf16.gmra.mxu1 %v2286_v8 }
 0x630   : > { %v2262_v53 = vmul.f32 %v5075_v13, %v2245_v11  ;;  %v2280_v49 = vadd.f32 %v2264_v52, %v2231_v45  ;;  %v3984_v13 = vld [vmem:[#allocation19 + $0x38] sm:$0xff]  }
 0x631   : > { %3762 = vmatprep.subr.bf16.mxu1 %v3984_v13 }
 0x632   : > { %v2278_v32 = vadd.f32 %v2262_v53, %v2229_v43  ;;  %v2288_v50 = vpack.c.bf16 %v2280_v49, %v2279_v46  ;;  %3763 = vmatpush3.bf16.msra.mxu1 %v3984_v13 }
 0x633   : > { %3764 = vmatprep.subr.bf16.mxu1 %v3985_v39 }
 0x634   : > { %v2287_v41 = vpack.c.bf16 %v2278_v32, %v2277_v37 }
 0x636   : > { %3726 = vmatprep.mubr.bf16.mxu1 %v2287_v41  ;;  %3765 = vmatpush3.bf16.msra.mxu1 %v3985_v39 }
 0x637   : > { %3727 = vmatmul.mubr.bf16.gmra.mxu1 %v2288_v50  ;;  %3766 = vmatprep.subr.bf16.mxu1 %v3986_v47 }
 0x63a   : > { %3767 = vmatpush3.bf16.msra.mxu1 %v3986_v47 }
 0x63b   : > { %3768 = vmatprep.subr.bf16.mxu1 %v3987_v4 }
 0x63e   : > { %3769 = vmatpush3.bf16.msra.mxu1 %v3987_v4 }
 0x6df   : > { %v3716_v2 = vpop.f32.mrf.mxu1 }
 0x6e0   : > { %v2401_v55 = vadd.f32 %v3716_v2, %v5108_v21 }
 0x6e1   : > { %v2392_v22 = vpop.f32.mrf.mxu1 }
 0x6e2   : > { %v2393_v23 = vadd.f32 %v5108_v21, %v2392_v22  ;;  %v2474_v26 = vmin.f32 %v2401_v55, 0.0  ;;  %v2458_v1 = vmax.f32 %v2401_v55, 0.0 }
 0x6e3   : > { %v3717_v56 = vpop.f32.mrf.mxu1 }
 0x6e4   : > { %v2404_v58 = vadd.f32 %v3717_v56, %v5108_v21  ;;  %v2472_v54 = vmin.f32 %v2393_v23, 0.0  ;;  %v2491_v38 = vmul.f32 %v5113_v28, %v2474_v26  ;;  %v2456_v12 = vmax.f32 %v2393_v23, 0.0 }
 0x6e5   : > { %v2395_v24 = vpop.f32.mrf.mxu1 }
 0x6e6   : > { %v2475_v27 = vmin.f32 %v2404_v58, 0.0  ;;  %v2396_v29 = vadd.f32 %v5108_v21, %v2395_v24  ;;  %v2489_v33 = vmul.f32 %v5113_v28, %v2472_v54  ;;  %v2459_v3 = vmax.f32 %v2404_v58, 0.0 }
 0x6e7   : > { %v3720_v30 = vpop.f32.mrf.mxu1  ;;  %v2507_v9 = vadd.f32 %v2491_v38, %v2458_v1 }
 0x6e8   : > { %v2492_v31 = vmul.f32 %v5113_v28, %v2475_v27  ;;  %v2473_v34 = vmin.f32 %v2396_v29, 0.0  ;;  %v2417_v35 = vadd.f32 %v3720_v30, %v5108_v21  ;;  %v2457_v57 = vmax.f32 %v2396_v29, 0.0 }
 0x6e9   : > { %v2408_v36 = vpop.f32.mrf.mxu1  ;;  %v2505_v18 = vadd.f32 %v2489_v33, %v2456_v12 }
 0x6ea   : > { %v2409_v7 = vadd.f32 %v5108_v21, %v2408_v36  ;;  %v2490_v6 = vmul.f32 %v5113_v28, %v2473_v34  ;;  %v2508_v14 = vadd.f32 %v2492_v31, %v2459_v3  ;;  %v2478_v16 = vmin.f32 %v2417_v35, 0.0 }
 0x6eb   : > { %v3721_v48 = vpop.f32.mrf.mxu1  ;;  %v2462_v37 = vmax.f32 %v2417_v35, 0.0 }
 0x6ec   : > { %v2476_v17 = vmin.f32 %v2409_v7, 0.0  ;;  %v2506_v19 = vadd.f32 %v2490_v6, %v2457_v57  ;;  %v2420_v15 = vadd.f32 %v3721_v48, %v5108_v21  ;;  %v2522_v42 = vpack.c.bf16 %v2508_v14, %v2507_v9 }
 0x6ed   : > { %v2411_v0 = vpop.f32.mrf.mxu1  ;;  %v2495_v10 = vmul.f32 %v5113_v28, %v2478_v16  ;;  %v2460_v11 = vmax.f32 %v2409_v7, 0.0 }
 0x6ee   : > { %v2412_v20 = vadd.f32 %v5108_v21, %v2411_v0  ;;  %v2479_v44 = vmin.f32 %v2420_v15, 0.0  ;;  %v2521_v59 = vpack.c.bf16 %v2506_v19, %v2505_v18  ;;  %v2493_v52 = vmul.f32 %v5113_v28, %v2476_v17 }
 0x6ef   : > { %v3724_v51 = vpop.f32.mrf.mxu1  ;;  %v2463_v43 = vmax.f32 %v2420_v15, 0.0  ;;  %v2511_v13 = vadd.f32 %v2495_v10, %v2462_v37 }
 0x6f0   : > { %v2477_v8 = vmin.f32 %v2412_v20, 0.0  ;;  %v2496_v5 = vmul.f32 %v5113_v28, %v2479_v44  ;;  %v2433_v45 = vadd.f32 %v3724_v51, %v5108_v21  ;;  %3746 = vmatprep.mubr.bf16.mxu0 %v2521_v59  ;;  %v2461_v53 = vmax.f32 %v2412_v20, 0.0 }
 0x6f1   : > { %v2424_v63 = vpop.f32.mrf.mxu1  ;;  %3747 = vmatmul.mubr.bf16.vlgmr.msra.gmra.mxu0 %v2522_v42  ;;  %v2509_v46 = vadd.f32 %v2493_v52, %v2460_v11  ;;  %v3988_v11 = vld [vmem:[#allocation19 + $0x18] sm:$0xff]  }
 0x6f2   : > { %v2494_v40 = vmul.f32 %v5113_v28, %v2477_v8  ;;  %v2425_v49 = vadd.f32 %v5108_v21, %v2424_v63  ;;  %v2512_v41 = vadd.f32 %v2496_v5, %v2463_v43  ;;  %v2482_v61 = vmin.f32 %v2433_v45, 0.0  ;;  %3770 = vmatprep.subr.bf16.mxu1 %v3988_v11  ;;  %v3989_v5 = vld [vmem:[#allocation19 + $0x10] sm:$0xff]   ;;  %v5147_v43 = vld [vmem:[%s5291_s30 + $0x2] ss:$0 sm:$0xff] }
 0x6f3   : > { %v3725_v32 = vpop.f32.mrf.mxu1  ;;  %v2466_v33 = vmax.f32 %v2433_v45, 0.0  ;;  %3771 = vmatpush3.bf16.msra.mxu1 %v3988_v11  ;;  %v3990_v45 = vld [vmem:[#allocation19 + $0x8] sm:$0xff]  }
 0x6f4   : > { %v2510_v50 = vadd.f32 %v2494_v40, %v2461_v53  ;;  %v2480_v25 = vmin.f32 %v2425_v49, 0.0  ;;  %v2436_v62 = vadd.f32 %v3725_v32, %v5108_v21  ;;  %v2524_v23 = vpack.c.bf16 %v2512_v41, %v2511_v13  ;;  %3772 = vmatprep.subr.bf16.mxu1 %v3989_v5 }
 0x6f5   : > { %v2427_v60 = vpop.f32.mrf.mxu1  ;;  %v2499_v56 = vmul.f32 %v5113_v28, %v2482_v61  ;;  %v2464_v58 = vmax.f32 %v2425_v49, 0.0  ;;  %v5152_v61 = vstv %s3273_s14 }
 0x6f6   : > { %v2428_v39 = vadd.f32 %v5108_v21, %v2427_v60  ;;  %v2523_v47 = vpack.c.bf16 %v2510_v50, %v2509_v46  ;;  %v2483_v4 = vmin.f32 %v2436_v62, 0.0  ;;  %v2497_v22 = vmul.f32 %v5113_v28, %v2480_v25 }
 0x6f7   : > { %v3728_v2 = vpop.f32.mrf.mxu1  ;;  %v2467_v27 = vmax.f32 %v2436_v62, 0.0  ;;  %v2515_v6 = vadd.f32 %v2499_v56, %v2466_v33  ;;  %3773 = vmatpush3.bf16.msra.mxu1 %v3989_v5 }
 0x6f8   : > { %v2481_v55 = vmin.f32 %v2428_v39, 0.0  ;;  %3750 = vmatprep.mubr.bf16.mxu0 %v2523_v47  ;;  %v2500_v54 = vmul.f32 %v5113_v28, %v2483_v4  ;;  %v2449_v24 = vadd.f32 %v3728_v2, %v5108_v21  ;;  %v2465_v29 = vmax.f32 %v2428_v39, 0.0  ;;  %3774 = vmatprep.subr.bf16.mxu1 %v3990_v45 }
 0x6f9   : > { %v2440_v26 = vpop.f32.mrf.mxu1  ;;  %3751 = vmatmul.mubr.bf16.gmra.mxu0 %v2524_v23  ;;  %v2513_v35 = vadd.f32 %v2497_v22, %v2464_v58 }
 0x6fa   : > { %v2498_v30 = vmul.f32 %v5113_v28, %v2481_v55  ;;  %v2441_v31 = vadd.f32 %v5108_v21, %v2440_v26  ;;  %v2516_v36 = vadd.f32 %v2500_v54, %v2467_v27  ;;  %v2486_v7 = vmin.f32 %v2449_v24, 0.0 }
 0x6fb   : > { %v3729_v34 = vpop.f32.mrf.mxu1  ;;  %v2470_v51 = vmax.f32 %v2449_v24, 0.0  ;;  %3775 = vmatpush3.bf16.msra.mxu1 %v3990_v45 }
 0x6fc   : > { %v2514_v38 = vadd.f32 %v2498_v30, %v2465_v29  ;;  %v2484_v3 = vmin.f32 %v2441_v31, 0.0  ;;  %v2452_v12 = vadd.f32 %v3729_v34, %v5108_v21  ;;  %v2526_v19 = vpack.c.bf16 %v2516_v36, %v2515_v6 }
 0x6fd   : > { %v2443_v57 = vpop.f32.mrf.mxu1  ;;  %v2503_v16 = vmul.f32 %v5113_v28, %v2486_v7  ;;  %v2468_v0 = vmax.f32 %v2441_v31, 0.0 }
 0x6fe   : > { %v2444_v48 = vadd.f32 %v5108_v21, %v2443_v57  ;;  %v2525_v1 = vpack.c.bf16 %v2514_v38, %v2513_v35  ;;  %v2487_v14 = vmin.f32 %v2452_v12, 0.0  ;;  %v2501_v17 = vmul.f32 %v5113_v28, %v2484_v3 }
 0x6ff   : > { %v2471_v9 = vmax.f32 %v2452_v12, 0.0  ;;  %v2519_v52 = vadd.f32 %v2503_v16, %v2470_v51 }
 0x700   : > { %v2485_v18 = vmin.f32 %v2444_v48, 0.0  ;;  %3754 = vmatprep.mubr.bf16.mxu0 %v2525_v1  ;;  %v2504_v15 = vmul.f32 %v5113_v28, %v2487_v14  ;;  %v2469_v20 = vmax.f32 %v2444_v48, 0.0  ;;  %v2517_v59 = vadd.f32 %v2501_v17, %v2468_v0 }
 0x701   : > { %3755 = vmatmul.mubr.bf16.gmra.mxu0 %v2526_v19 }
 0x702   : > { %v2502_v44 = vmul.f32 %v5113_v28, %v2485_v18  ;;  %v2520_v21 = vadd.f32 %v2504_v15, %v2471_v9  ;;  %v3991_v28 = vld [vmem:[#allocation19] sm:$0xff]  }
 0x703   : > { %3776 = vmatprep.subr.bf16.mxu1 %v3991_v28 }
 0x704   : > { %v2518_v42 = vadd.f32 %v2502_v44, %v2469_v20  ;;  %v2528_v10 = vpack.c.bf16 %v2520_v21, %v2519_v52  ;;  %3777 = vmatpush3.bf16.msra.mxu1 %v3991_v28 }
 0x706   : > { %v2527_v8 = vpack.c.bf16 %v2518_v42, %v2517_v59 }
 0x708   : > { %3758 = vmatprep.mubr.bf16.mxu0 %v2527_v8 }
 0x709   : > { %3759 = vmatmul.mubr.bf16.gmra.mxu0 %v2528_v10 }
 0x7b1   : > { %v3748_v63 = vpop.f32.mrf.mxu0 }
 0x7b2   : > { %v2641_v40 = vadd.f32 %v3748_v63, %v5147_v43 }
 0x7b3   : > { %v2632_v53 = vpop.f32.mrf.mxu0 }
 0x7b4   : > { %v2633_v49 = vadd.f32 %v5147_v43, %v2632_v53  ;;  %v2714_v50 = vmin.f32 %v2641_v40, 0.0  ;;  %v2698_v26 = vmax.f32 %v2641_v40, 0.0 }
 0x7b5   : > { %v3749_v37 = vpop.f32.mrf.mxu0 }
 0x7b6   : > { %v2644_v32 = vadd.f32 %v3749_v37, %v5147_v43  ;;  %v2712_v46 = vmin.f32 %v2633_v49, 0.0  ;;  %v2731_v22 = vmul.f32 %v5152_v61, %v2714_v50  ;;  %v2696_v56 = vmax.f32 %v2633_v49, 0.0 }
 0x7b7   : > { %v2635_v41 = vpop.f32.mrf.mxu0 }
 0x7b8   : > { %v2715_v25 = vmin.f32 %v2644_v32, 0.0  ;;  %v2636_v62 = vadd.f32 %v5147_v43, %v2635_v41  ;;  %v2729_v39 = vmul.f32 %v5152_v61, %v2712_v46  ;;  %v2699_v55 = vmax.f32 %v2644_v32, 0.0 }
 0x7b9   : > { %v3752_v60 = vpop.f32.mrf.mxu0  ;;  %v2747_v36 = vadd.f32 %v2731_v22, %v2698_v26 }
 0x7ba   : > { %v2732_v13 = vmul.f32 %v5152_v61, %v2715_v25  ;;  %v2713_v47 = vmin.f32 %v2636_v62, 0.0  ;;  %v2657_v4 = vadd.f32 %v3752_v60, %v5147_v43  ;;  %v2697_v58 = vmax.f32 %v2636_v62, 0.0 }
 0x7bb   : > { %v2648_v2 = vpop.f32.mrf.mxu0  ;;  %v2745_v30 = vadd.f32 %v2729_v39, %v2696_v56 }
 0x7bc   : > { %v2649_v23 = vadd.f32 %v5147_v43, %v2648_v2  ;;  %v2730_v54 = vmul.f32 %v5152_v61, %v2713_v47  ;;  %v2748_v27 = vadd.f32 %v2732_v13, %v2699_v55  ;;  %v2718_v33 = vmin.f32 %v2657_v4, 0.0 }
 0x7bd   : > { %v3753_v24 = vpop.f32.mrf.mxu0  ;;  %v2702_v20 = vmax.f32 %v2657_v4, 0.0 }
 0x7be   : > { %v2716_v29 = vmin.f32 %v2649_v23, 0.0  ;;  %v2746_v31 = vadd.f32 %v2730_v54, %v2697_v58  ;;  %v2660_v34 = vadd.f32 %v3753_v24, %v5147_v43  ;;  %v2762_v57 = vpack.c.bf16 %v2748_v27, %v2747_v36 }
 0x7bf   : > { %v2651_v35 = vpop.f32.mrf.mxu0  ;;  %v2735_v1 = vmul.f32 %v5152_v61, %v2718_v33  ;;  %v2700_v14 = vmax.f32 %v2649_v23, 0.0 }
 0x7c0   : > { %v2652_v38 = vadd.f32 %v5147_v43, %v2651_v35  ;;  %v2719_v3 = vmin.f32 %v2660_v34, 0.0  ;;  %v2761_v12 = vpack.c.bf16 %v2746_v31, %v2745_v30  ;;  %v2733_v6 = vmul.f32 %v5152_v61, %v2716_v29 }
 0x7c1   : > { %v3756_v7 = vpop.f32.mrf.mxu0  ;;  %v2703_v16 = vmax.f32 %v2660_v34, 0.0  ;;  %v2751_v11 = vadd.f32 %v2735_v1, %v2702_v20 }
 0x7c2   : > { %v2717_v48 = vmin.f32 %v2652_v38, 0.0  ;;  %v2736_v17 = vmul.f32 %v5152_v61, %v2719_v3  ;;  %v2673_v18 = vadd.f32 %v3756_v7, %v5147_v43  ;;  %3778 = vmatprep.mubr.bf16.mxu1 %v2761_v12  ;;  %v2701_v15 = vmax.f32 %v2652_v38, 0.0 }
 0x7c3   : > { %v2664_v19 = vpop.f32.mrf.mxu0  ;;  %3779 = vmatmul.mubr.bf16.vlgmr.msra.gmra.mxu1 %v2762_v57  ;;  %v2749_v51 = vadd.f32 %v2733_v6, %v2700_v14  ;;  %v3274_v14 = vld [vmem:[%s5292_s29] ss:$0 sm:$0xff] }
 0x7c4   : > { %v2734_v0 = vmul.f32 %v5152_v61, %v2717_v48  ;;  %v2665_v9 = vadd.f32 %v5147_v43, %v2664_v19  ;;  %v2752_v59 = vadd.f32 %v2736_v17, %v2703_v16  ;;  %v2722_v52 = vmin.f32 %v2673_v18, 0.0 }
 0x7c5   : > { %v3757_v44 = vpop.f32.mrf.mxu0  ;;  %v2706_v39 = vmax.f32 %v2673_v18, 0.0 }
 0x7c6   : > { %v2750_v21 = vadd.f32 %v2734_v0, %v2701_v15  ;;  %v2720_v42 = vmin.f32 %v2665_v9, 0.0  ;;  %v2676_v8 = vadd.f32 %v3757_v44, %v5147_v43  ;;  %v2764_v49 = vpack.c.bf16 %v2752_v59, %v2751_v11 }
 0x7c7   : > { %v2667_v10 = vpop.f32.mrf.mxu0  ;;  %v2739_v37 = vmul.f32 %v5152_v61, %v2722_v52  ;;  %v2704_v32 = vmax.f32 %v2665_v9, 0.0 }
 0x7c8   : > { %v2668_v5 = vadd.f32 %v5147_v43, %v2667_v10  ;;  %v2763_v45 = vpack.c.bf16 %v2750_v21, %v2749_v51  ;;  %v2723_v28 = vmin.f32 %v2676_v8, 0.0  ;;  %v2737_v53 = vmul.f32 %v5152_v61, %v2720_v42 }
 0x7c9   : > { %v3760_v63 = vpop.f32.mrf.mxu0  ;;  %v2707_v25 = vmax.f32 %v2676_v8, 0.0  ;;  %v2755_v54 = vadd.f32 %v2739_v37, %v2706_v39 }
 0x7ca   : > { %v2721_v40 = vmin.f32 %v2668_v5, 0.0  ;;  %3782 = vmatprep.mubr.bf16.mxu1 %v2763_v45  ;;  %v2740_v46 = vmul.f32 %v5152_v61, %v2723_v28  ;;  %v2689_v41 = vadd.f32 %v3760_v63, %v5147_v43  ;;  %v2705_v62 = vmax.f32 %v2668_v5, 0.0 }
 0x7cb   : > { %v2680_v50 = vpop.f32.mrf.mxu0  ;;  %3783 = vmatmul.mubr.bf16.gmra.mxu1 %v2764_v49  ;;  %v2753_v4 = vadd.f32 %v2737_v53, %v2704_v32 }
 0x7cc   : > { %v2738_v60 = vmul.f32 %v5152_v61, %v2721_v40  ;;  %v2681_v13 = vadd.f32 %v5147_v43, %v2680_v50  ;;  %v2756_v2 = vadd.f32 %v2740_v46, %v2707_v25  ;;  %v2726_v23 = vmin.f32 %v2689_v41, 0.0 }
 0x7cd   : > { %v3761_v47 = vpop.f32.mrf.mxu0  ;;  %v2710_v7 = vmax.f32 %v2689_v41, 0.0 }
 0x7ce   : > { %v2754_v22 = vadd.f32 %v2738_v60, %v2705_v62  ;;  %v2724_v55 = vmin.f32 %v2681_v13, 0.0  ;;  %v2692_v56 = vadd.f32 %v3761_v47, %v5147_v43  ;;  %v2766_v31 = vpack.c.bf16 %v2756_v2, %v2755_v54 }
 0x7cf   : > { %v2683_v58 = vpop.f32.mrf.mxu0  ;;  %v2743_v33 = vmul.f32 %v5152_v61, %v2726_v23  ;;  %v2708_v35 = vmax.f32 %v2681_v13, 0.0 }
 0x7d0   : > { %v2684_v24 = vadd.f32 %v5147_v43, %v2683_v58  ;;  %v2765_v26 = vpack.c.bf16 %v2754_v22, %v2753_v4  ;;  %v2727_v27 = vmin.f32 %v2692_v56, 0.0  ;;  %v2741_v29 = vmul.f32 %v5152_v61, %v2724_v55 }
 0x7d1   : > { %v2711_v36 = vmax.f32 %v2692_v56, 0.0  ;;  %v2759_v6 = vadd.f32 %v2743_v33, %v2710_v7 }
 0x7d2   : > { %v2725_v30 = vmin.f32 %v2684_v24, 0.0  ;;  %3786 = vmatprep.mubr.bf16.mxu1 %v2765_v26  ;;  %v2744_v34 = vmul.f32 %v5152_v61, %v2727_v27  ;;  %v2709_v38 = vmax.f32 %v2684_v24, 0.0  ;;  %v2757_v12 = vadd.f32 %v2741_v29, %v2708_v35 }
 0x7d3   : > { %3787 = vmatmul.mubr.bf16.gmra.mxu1 %v2766_v31 }
 0x7d4   : > { %v2742_v3 = vmul.f32 %v5152_v61, %v2725_v30  ;;  %v2760_v43 = vadd.f32 %v2744_v34, %v2711_v36 }
 0x7d6   : > { %v2758_v57 = vadd.f32 %v2742_v3, %v2709_v38  ;;  %v2768_v1 = vpack.c.bf16 %v2760_v43, %v2759_v6 }
 0x7d8   : > { %v2767_v48 = vpack.c.bf16 %v2758_v57, %v2757_v12 }
 0x7da   : > { %3790 = vmatprep.mubr.bf16.mxu1 %v2767_v48 }
 0x7db   : > { %3791 = vmatmul.mubr.bf16.gmra.mxu1 %v2768_v1 }
 0x883   : > { %v3780_v17 = vpop.f32.mrf.mxu1 }
 0x884   : > { %v2883_v18 = vadd.f32 %v3780_v17, %v3274_v14 }
 0x885   : > { %v2874_v19 = vpop.f32.mrf.mxu1 }
 0x886   : > { %2939 = vst [vmem:[#allocation21 + $0x10] sm:$0xff] %v2883_v18  ;;  %v2875_v16 = vadd.f32 %v3274_v14, %v2874_v19 }
 0x887   : > { %v3781_v61 = vpop.f32.mrf.mxu1 }
 0x888   : > { %2937 = vst [vmem:[#allocation21] sm:$0xff] %v2875_v16  ;;  %v2886_v15 = vadd.f32 %v3781_v61, %v3274_v14 }
 0x889   : > { %v2877_v0 = vpop.f32.mrf.mxu1 }
 0x88a   : > { %2940 = vst [vmem:[#allocation21 + $0x18] sm:$0xff] %v2886_v15  ;;  %v2878_v9 = vadd.f32 %v3274_v14, %v2877_v0 }
 0x88b   : > { %v3784_v20 = vpop.f32.mrf.mxu1 }
 0x88c   : > { %2938 = vst [vmem:[#allocation21 + $0x8] sm:$0xff] %v2878_v9  ;;  %v2899_v44 = vadd.f32 %v3784_v20, %v3274_v14 }
 0x88d   : > { %v2890_v51 = vpop.f32.mrf.mxu1 }
 0x88e   : > { %2943 = vst [vmem:[#allocation21 + $0x30] sm:$0xff] %v2899_v44  ;;  %v2891_v59 = vadd.f32 %v3274_v14, %v2890_v51 }
 0x88f   : > { %v3785_v21 = vpop.f32.mrf.mxu1 }
 0x890   : > { %2941 = vst [vmem:[#allocation21 + $0x20] sm:$0xff] %v2891_v59  ;;  %v2902_v42 = vadd.f32 %v3785_v21, %v3274_v14 }
 0x891   : > { %v2893_v52 = vpop.f32.mrf.mxu1 }
 0x892   : > { %2944 = vst [vmem:[#allocation21 + $0x38] sm:$0xff] %v2902_v42  ;;  %v2894_v8 = vadd.f32 %v3274_v14, %v2893_v52 }
 0x893   : > { %v3788_v10 = vpop.f32.mrf.mxu1 }
 0x894   : > { %2942 = vst [vmem:[#allocation21 + $0x28] sm:$0xff] %v2894_v8  ;;  %v2915_v11 = vadd.f32 %v3788_v10, %v3274_v14 }
 0x895   : > { %v2906_v5 = vpop.f32.mrf.mxu1 }
 0x896   : > { %2947 = vst [vmem:[#allocation21 + $0x50] sm:$0xff] %v2915_v11  ;;  %v2907_v45 = vadd.f32 %v3274_v14, %v2906_v5 }
 0x897   : > { %v3789_v28 = vpop.f32.mrf.mxu1 }
 0x898   : > { %2945 = vst [vmem:[#allocation21 + $0x40] sm:$0xff] %v2907_v45  ;;  %v2918_v63 = vadd.f32 %v3789_v28, %v3274_v14 }
 0x899   : > { %v2909_v53 = vpop.f32.mrf.mxu1 }
 0x89a   : > { %2948 = vst [vmem:[#allocation21 + $0x58] sm:$0xff] %v2918_v63  ;;  %v2910_v40 = vadd.f32 %v3274_v14, %v2909_v53 }
 0x89b   : > { %v3792_v49 = vpop.f32.mrf.mxu1 }
 0x89c   : > { %2946 = vst [vmem:[#allocation21 + $0x48] sm:$0xff] %v2910_v40  ;;  %v2931_v37 = vadd.f32 %v3792_v49, %v3274_v14 }
 0x89d   : > { %v2922_v32 = vpop.f32.mrf.mxu1 }
 0x89e   : > { %2951 = vst [vmem:[#allocation21 + $0x70] sm:$0xff] %v2931_v37  ;;  %v2923_v46 = vadd.f32 %v3274_v14, %v2922_v32 }
 0x89f   : > { %v3793_v41 = vpop.f32.mrf.mxu1 }
 0x8a0   : > { %2949 = vst [vmem:[#allocation21 + $0x60] sm:$0xff] %v2923_v46  ;;  %v2934_v50 = vadd.f32 %v3793_v41, %v3274_v14 }
 0x8a1   : > { %v2925_v25 = vpop.f32.mrf.mxu1 }
 0x8a2   : > { %2952 = vst [vmem:[#allocation21 + $0x78] sm:$0xff] %v2934_v50  ;;  %v2926_v62 = vadd.f32 %v3274_v14, %v2925_v25 }
 0x8a4   : > { %2950 = vst [vmem:[#allocation21 + $0x68] sm:$0xff] %v2926_v62 }
 0x8a5 PF: > { %s4311_s17 = smov [#allocation21]  }
 0x8a6   : > { %s2959_s0 = sshll.u32 %s4311_s17, 4  ;;  %s2960_s0 = int_to_ptr.vmem [resolvable:$true] %s2959_s0 }
 0x8a7   : > { %s4206_s3 = scalar_lea.vmem %s2960_s0, 2048  ;;  %p4213_p5 = scmp.lt.s32.totalorder %s2960_s0, %s2960_s0 }
 0x8a8   : > { %p4207_p10 = scmp.ne.s32.totalorder %s2960_s0, %s4206_s3  ;;  %p4214_p9 = scmp.lt.s32.totalorder %s4206_s3, %s4206_s3 }
 0x8aa   : > { %p4208_p11 = pnand %p4207_p10, %p3243_p13  ;;  %p4215_p12 = por %p4214_p9, %p4213_p5 }
 0x8ac   : > { %p4209_p2 = pneg %p4208_p11 }
 0x8ae   : > { %p4216_p0 = pnand %p4215_p12, %p4209_p2 }
 0x8b0   : > { %4219 = shalt.err (!%p4216_p0)
}
 0x8b1   : > { %s4312_s2 = smov 128   ;;  %s4313_s18 = smov 8  }
 0x8b2   : > { %s5293_s9 = sld [smem:[#allocation43_spill]] }
 0x8b8   : > { %3826 = dma.vmem_to_hbm [thread:$0]  (%p3243_p13), %s2960_s0, 2048, %s5293_s9, [#allocation7], %s4312_s2, %s4312_s2, %s4313_s18  }
 0x8b9   : > { %4279 = dma.done.wait (%p3243_p13), [#allocation7], 2048  }
 0x8ba   : > { %4281 = vsyncadd (%p3243_p13), [#allocation7], 4294965248 }
 0x8bb PF: > { %s5294_s24 = sld [smem:[#allocation32_spill]]  ;;  %s5297_s21 = smov %s4288_s22 }
 0x8bc   : > { %s5295_s4 = sld [smem:[#allocation31_spill]] }
 0x8bd   : > { %s5296_s23 = sld [smem:[#allocation33_spill]] }
 0x8c1   : > { %p34_p1 = scmp.ge.s32.totalorder %s5294_s24, 8  }
 0x8c2   : > { %s5298_s22 = smov %s5295_s4 }
 0x8c3   :  { %36 = sbr.rel (!%p34_p1) target bundleno = 21 (0x15), region = 187 }
 0x8c8   :  { %2975 = vsyncpa [#allocation6], 1 }
 0x8c9   :  { %2977 = vsyncpa [#allocation6 + $0x1], 1 }
 0x8ca   :  { %2978 = vsyncpa [#allocation11], 1 }
 0x8cb   :  { %2980 = vsyncpa [#allocation11 + $0x1], 1 }
 0x8cc   :  { %2981 = vsyncpa [#allocation15], 1 }
 0x8cd   :  { %2983 = vsyncpa [#allocation15 + $0x1], 1 }
 0x8ce   :  { %2984 = vsyncpa [#allocation18], 1 }
 0x8cf   :  { %2985 = vsyncpa [#allocation7], 1 }
 0x8d0   :  { %2987 = vsyncpa [#allocation7 + $0x1], 1 }
 0x8d1   :  { %2988 = vsyncpa [#allocation8], 1 }
 0x8d2   :  { %2990 = vsyncpa [#allocation8 + $0x1], 1 }
 0x8d3   :  { %2991 = vsyncpa [#allocation9], 1 }
 0x8d4   :  { %2993 = vsyncpa [#allocation9 + $0x1], 1 }

</bundles_post_ra>
